<compile_context>
chip_gen: v6e
topology: v6e:2x2x1
jax: 0.10.0
libtpu: 0.0.40
codegen_flags: <defaults>
</compile_context>

<pallas_src>
import functools

import jax
import jax.numpy as jnp
from jax.experimental import pallas as pl
from jax.experimental.pallas import tpu as pltpu


def _layer_norm(h, gamma, beta, eps=1e-5):
    # torch.nn.LayerNorm semantics: biased variance over last dim, eps in sqrt
    mu = jnp.mean(h, axis=-1, keepdims=True)
    var = jnp.mean((h - mu) ** 2, axis=-1, keepdims=True)
    return (h - mu) * jax.lax.rsqrt(var + eps) * gamma + beta


def _encoder_layer_kernel(num_heads, compute_dtype, approx_recip,
                          has_attn_mask, has_pad_mask, *refs):
    it = iter(refs)
    x_ref = next(it)
    am_ref = next(it) if has_attn_mask else None
    pad_ref = next(it) if has_pad_mask else None
    (wq_ref, wk_ref, wv_ref, wo_ref, w1_ref, w2_ref,
     qkv_b_ref, vecs_ref, b1_ref, out_ref) = it

    x = x_ref[...]                                   # (T, E) f32, one sequence
    T, E = x.shape
    H = num_heads
    hd = E // H
    scaling = float(hd) ** -0.5
    cd = compute_dtype

    def dg(a, b, dnums):
        # MXU matmul: operands optionally bf16, accumulate in f32.
        return jax.lax.dot_general(a.astype(cd), b.astype(cd), dnums,
                                   preferred_element_type=jnp.float32)

    AxBT = (((1,), (1,)), ((), ()))                  # contract last dims: A @ B^T

    qkv_b = qkv_b_ref[...]                           # (E, 3) packed q/k/v biases
    # (E,3) pads lanes to 128 (few-KiB VMEM slop) - documented as negligible.
    vecs = vecs_ref[...]                             # (6, E) packed row vectors

    # --- q/k/v projections in feature-major (column) form (E, T) ---
    qt = (dg(wq_ref[...], x, AxBT) + qkv_b[:, 0:1]) * scaling
    kt = dg(wk_ref[...], x, AxBT) + qkv_b[:, 1:2]
    vt = dg(wv_ref[...], x, AxBT) + qkv_b[:, 2:3]

    # Head split = free leading-dim reshape of the sublane axis.
    q3 = qt.reshape(H, hd, T)                        # (H, hd, T)
    k3 = kt.reshape(H, hd, T)
    v3 = vt.reshape(H, hd, T)

    # All heads in ONE batched contraction (head = dot_general batch dim); no
    # per-head loop, no scratch round-trip: s[h, i, j] = q_i . k_j
    s = dg(q3, k3, (((1,), (1,)), ((0,), (0,))))     # (H, T, T)
    if has_attn_mask:
        s = s + am_ref[...]                          # (T, T) additive mask
    if has_pad_mask:
        s = s + pad_ref[...]                         # (1, T) key-padding bias

    s = s - jnp.max(s, axis=-1, keepdims=True)
    p = jnp.exp(s)
    # approx=True lowers to the EUP vrcp slot (free); exact on f32 check path.
    p = p * pl.reciprocal(jnp.sum(p, axis=-1, keepdims=True), approx=approx_recip)

    # ctx[h, d, i] = sum_j v[h, d, j] * p[h, i, j]  -> (H, hd, T) column form
    ctx = dg(v3, p, (((2,), (2,)), ((0,), (0,))))
    ctx = jnp.transpose(ctx.reshape(E, T))           # single 2-D transpose -> (T, E)

    attn = dg(ctx, wo_ref[...], AxBT) + vecs[0:1, :]

    # residual + self_attn_layer_norm
    h1 = _layer_norm(x + attn, vecs[1:2, :], vecs[2:3, :])

    # FFN: relu(fc1) -> fc2
    f = dg(h1, w1_ref[...], AxBT) + b1_ref[...]
    f = jnp.maximum(f, 0.0)
    f = dg(f, w2_ref[...], AxBT) + vecs[3:4, :]

    # residual + final_layer_norm
    out_ref[...] = _layer_norm(h1 + f, vecs[4:5, :], vecs[5:6, :])


def transformer_sentence_encoder_layer(x_tbe, twod_tokens, is_twod, params,
                                       num_heads,
                                       self_attn_mask=None,
                                       self_attn_padding_mask=None,
                                       compute_dtype=jnp.bfloat16,
                                       approx_softmax_recip=None):
    """x_tbe: (T, B, E) float32. Returns (x_out (T,B,E), attn=None, twod_tokens)."""
    T, B, E = x_tbe.shape
    F = params["w1"].shape[0]
    if approx_softmax_recip is None:
        approx_softmax_recip = jnp.dtype(compute_dtype) != jnp.dtype(jnp.float32)

    # Batch-major repack: attention becomes block-diagonal per grid step, so no
    # cross-batch mask and no O((B*T)^2) bias are ever built.
    x_bte = jnp.transpose(x_tbe, (1, 0, 2)).astype(jnp.float32)   # (B, T, E)

    has_attn_mask = self_attn_mask is not None
    has_pad_mask = self_attn_padding_mask is not None

    inputs = [x_bte]
    in_specs = [pl.BlockSpec((None, T, E), lambda b: (b, 0, 0))]
    if has_attn_mask:                       # (T, T) additive mask, torch semantics
        inputs.append(self_attn_mask.astype(jnp.float32))
        in_specs.append(pl.BlockSpec((T, T), lambda b: (0, 0)))
    if has_pad_mask:                        # (B, T) bool, True = pad -> key bias
        pad_bias = jnp.where(self_attn_padding_mask,
                             jnp.float32(-1e30), jnp.float32(0.0)).reshape(B, 1, T)
        inputs.append(pad_bias)
        in_specs.append(pl.BlockSpec((None, 1, T), lambda b: (b, 0, 0)))

    # Weights stay in torch nn.Linear (out, in) layout. bf16 operands halve DMA
    # bytes / double MXU throughput (f32 accumulation either way). Constant
    # index_maps keep them VMEM-resident across the batch grid.
    ws = [params[k].astype(compute_dtype)
          for k in ("wq", "wk", "wv", "wo", "w1", "w2")]
    # Small per-channel vectors packed to cut DMA descriptor count.
    qkv_b = jnp.stack([params["bq"], params["bk"], params["bv"]], axis=1)  # (E, 3)
    vecs = jnp.stack([params["bo"],
                      params["ln1_g"], params["ln1_b"],
                      params["b2"],
                      params["ln2_g"], params["ln2_b"]], axis=0)           # (6, E)
    b1 = params["b1"].reshape(1, F)

    smalls = ws + [qkv_b, vecs, b1]
    inputs += smalls
    in_specs += [pl.BlockSpec(a.shape, lambda b, _nd=a.ndim: (0,) * _nd)
                 for a in smalls]

    kernel = functools.partial(_encoder_layer_kernel, num_heads, compute_dtype,
                               approx_softmax_recip, has_attn_mask, has_pad_mask)

    itemsize = jnp.dtype(compute_dtype).itemsize
    weight_bytes = sum(int(w.size) for w in ws) * itemsize
    cost = pl.CostEstimate(
        flops=int(8 * B * T * E * E + 4 * B * T * E * F + 4 * B * T * T * E),
        transcendentals=int(B * num_heads * T * T),
        bytes_accessed=int(2 * B * T * E * 4 + weight_bytes
                           + 4 * (qkv_b.size + vecs.size + b1.size)),
    )

    out_bte = pl.pallas_call(
        kernel,
        grid=(B,),
        in_specs=in_specs,
        out_specs=pl.BlockSpec((None, T, E), lambda b: (b, 0, 0)),
        out_shape=jax.ShapeDtypeStruct((B, T, E), jnp.float32),
        cost_estimate=cost,
        compiler_params=pltpu.CompilerParams(
            dimension_semantics=("parallel",)),
    )(*inputs)

    x_out = jnp.transpose(out_bte, (1, 0, 2))
    return x_out, None, twod_tokens


# ---------------- reference (pure JAX) for correctness check ----------------
def _reference(x_tbe, params, num_heads, attn_mask=None, padding_mask=None):
    T, B, E = x_tbe.shape
    hd = E // num_heads
    scaling = float(hd) ** -0.5
    x = jnp.transpose(x_tbe, (1, 0, 2))                      # (B, T, E)
    q = (x @ params["wq"].T + params["bq"]) * scaling
    k = x @ params["wk"].T + params["bk"]
    v = x @ params["wv"].T + params["bv"]
    q = q.reshape(B, T, num_heads, hd).transpose(0, 2, 1, 3)
    k = k.reshape(B, T, num_heads, hd).transpose(0, 2, 1, 3)
    v = v.reshape(B, T, num_heads, hd).transpose(0, 2, 1, 3)
    s = jnp.einsum("bhqd,bhkd->bhqk", q, k)
    if attn_mask is not None:
        s = s + attn_mask
    if padding_mask is not None:
        s = s + jnp.where(padding_mask, -1e30, 0.0)[:, None, None, :]
    p = jax.nn.softmax(s, axis=-1)
    ctx = jnp.einsum("bhqk,bhkd->bhqd", p, v)
    ctx = ctx.transpose(0, 2, 1, 3).reshape(B, T, E)
    attn_out = ctx @ params["wo"].T + params["bo"]
    h1 = _layer_norm(x + attn_out, params["ln1_g"], params["ln1_b"])
    f = jnp.maximum(h1 @ params["w1"].T + params["b1"], 0.0)
    f = f @ params["w2"].T + params["b2"]
    h2 = _layer_norm(h1 + f, params["ln2_g"], params["ln2_b"])
    return jnp.transpose(h2, (1, 0, 2))


def _init_params(key, embed_dim, ffn_dim):
    ks = jax.random.split(key, 10)
    E, F = embed_dim, ffn_dim

    def xavier(k, out_f, in_f, gain=1.0):
        limit = gain * (6.0 / (in_f + out_f)) ** 0.5
        return jax.random.uniform(k, (out_f, in_f), jnp.float32, -limit, limit)

    g = 1.0 / (2.0 ** 0.5)  # xavier gain 1/sqrt(2) as in reset_parameters
    return {
        # nn.Linear layout: (out_features, in_features); y = x @ W.T + b
        "wq": xavier(ks[0], E, E, g),
        "bq": 0.01 * jax.random.normal(ks[1], (E,), jnp.float32),
        "wk": xavier(ks[2], E, E, g),
        "bk": 0.01 * jax.random.normal(ks[3], (E,), jnp.float32),
        "wv": xavier(ks[4], E, E, g),
        "bv": 0.01 * jax.random.normal(ks[5], (E,), jnp.float32),
        "wo": xavier(ks[6], E, E, 1.0),
        "bo": jnp.zeros((E,), jnp.float32),
        "ln1_g": jnp.ones((E,), jnp.float32),
        "ln1_b": jnp.zeros((E,), jnp.float32),
        "w1": xavier(ks[7], F, E, 1.0),
        "b1": 0.01 * jax.random.normal(ks[8], (F,), jnp.float32),
        "w2": xavier(ks[9], E, F, 1.0),
        "b2": jnp.zeros((E,), jnp.float32),
        "ln2_g": jnp.ones((E,), jnp.float32),
        "ln2_b": jnp.zeros((E,), jnp.float32),
    }


if __name__ == "__main__":
    T, B, E, H, F = 16, 2, 64, 8, 128

    key = jax.random.PRNGKey(0)
    kx, kt, kp = jax.random.split(key, 3)
    x = jax.random.normal(kx, (T, B, E), jnp.float32)            # (time, batch, embed)
    twod_tokens = jax.random.normal(kt, (B, T, T), jnp.float32)  # pass-through
    params = _init_params(kp, E, F)

    ref = _reference(x, params, H)

    # 1) strict correctness: f32 MXU operands, exact softmax reciprocal
    out32, attn, twod_new = transformer_sentence_encoder_layer(
        x, twod_tokens, is_twod=False, params=params, num_heads=H,
        compute_dtype=jnp.float32)
    out32 = jax.block_until_ready(out32)
    assert out32.shape == (T, B, E)
    assert attn is None
    err32 = float(jnp.max(jnp.abs(out32 - ref)))
    assert err32 < 5e-4, f"f32 kernel/reference mismatch: {err32}"

    # 2) default fast path: bf16 MXU operands + approximate (EUP) reciprocal
    outbf, _, _ = transformer_sentence_encoder_layer(
        x, twod_tokens, is_twod=False, params=params, num_heads=H)
    outbf = jax.block_until_ready(outbf)
    errbf = float(jnp.max(jnp.abs(outbf - ref)))
    assert errbf < 1e-1, f"bf16 kernel/reference mismatch: {errbf}"

    # 3) key-padding-mask path (block-diagonal attention + per-batch key bias)
    pad = jnp.zeros((B, T), jnp.bool_).at[1, T - 4:].set(True)
    outp, _, _ = transformer_sentence_encoder_layer(
        x, twod_tokens, is_twod=False, params=params, num_heads=H,
        self_attn_padding_mask=pad, compute_dtype=jnp.float32)
    outp = jax.block_until_ready(outp)
    refp = _reference(x, params, H, padding_mask=pad)
    errp = float(jnp.max(jnp.abs(outp - refp)))
    assert errp < 5e-4, f"padding-mask kernel/reference mismatch: {errp}"

    print("KERNEL_OK")
</pallas_src>

<mosaic_0001>
module attributes {stable_mosaic.version = 11 : i64} {
  func.func @_encoder_layer_kernel(%arg0: i32, %arg1: memref<1x16x64xf32, #tpu.memory_space<vmem>>, %arg2: memref<64x64xf32, #tpu.memory_space<vmem>>, %arg3: memref<64x64xf32, #tpu.memory_space<vmem>>, %arg4: memref<64x64xf32, #tpu.memory_space<vmem>>, %arg5: memref<64x64xf32, #tpu.memory_space<vmem>>, %arg6: memref<128x64xf32, #tpu.memory_space<vmem>>, %arg7: memref<64x128xf32, #tpu.memory_space<vmem>>, %arg8: memref<64x3xf32, #tpu.memory_space<vmem>>, %arg9: memref<6x64xf32, #tpu.memory_space<vmem>>, %arg10: memref<1x128xf32, #tpu.memory_space<vmem>>, %arg11: memref<1x16x64xf32, #tpu.memory_space<vmem>>) attributes {dimension_semantics = [#tpu.dimension_semantics<parallel>], iteration_bounds = array<i64: 2>, scalar_prefetch = 0 : i64, scratch_operands = 0 : i64, tpu.core_type = #tpu.core_type<tc>, window_params = [{transform_indices = @transform_0, window_bounds = array<i64: 1, 16, 64>}, {pipeline_mode = #tpu.pipeline_mode<synchronous>, transform_indices = @transform_1, window_bounds = array<i64: 64, 64>}, {pipeline_mode = #tpu.pipeline_mode<synchronous>, transform_indices = @transform_2, window_bounds = array<i64: 64, 64>}, {pipeline_mode = #tpu.pipeline_mode<synchronous>, transform_indices = @transform_3, window_bounds = array<i64: 64, 64>}, {pipeline_mode = #tpu.pipeline_mode<synchronous>, transform_indices = @transform_4, window_bounds = array<i64: 64, 64>}, {pipeline_mode = #tpu.pipeline_mode<synchronous>, transform_indices = @transform_5, window_bounds = array<i64: 128, 64>}, {pipeline_mode = #tpu.pipeline_mode<synchronous>, transform_indices = @transform_6, window_bounds = array<i64: 64, 128>}, {pipeline_mode = #tpu.pipeline_mode<synchronous>, transform_indices = @transform_7, window_bounds = array<i64: 64, 3>}, {pipeline_mode = #tpu.pipeline_mode<synchronous>, transform_indices = @transform_8, window_bounds = array<i64: 6, 64>}, {pipeline_mode = #tpu.pipeline_mode<synchronous>, transform_indices = @transform_9, window_bounds = array<i64: 1, 128>}, {transform_indices = @transform_10, window_bounds = array<i64: 1, 16, 64>}]} {
    %c0 = arith.constant 0 : index
    %c0_0 = arith.constant 0 : index
    %c0_1 = arith.constant 0 : index
    %0 = vector.load %arg1[%c0, %c0_0, %c0_1] : memref<1x16x64xf32, #tpu.memory_space<vmem>>, vector<1x16x64xf32>
    %1 = vector.shape_cast %0 : vector<1x16x64xf32> to vector<16x64xf32>
    %c0_2 = arith.constant 0 : index
    %c0_3 = arith.constant 0 : index
    %2 = vector.load %arg8[%c0_2, %c0_3] : memref<64x3xf32, #tpu.memory_space<vmem>>, vector<64x3xf32>
    %c0_4 = arith.constant 0 : index
    %c0_5 = arith.constant 0 : index
    %3 = vector.load %arg9[%c0_4, %c0_5] : memref<6x64xf32, #tpu.memory_space<vmem>>, vector<6x64xf32>
    %c0_6 = arith.constant 0 : index
    %c0_7 = arith.constant 0 : index
    %4 = vector.load %arg2[%c0_6, %c0_7] : memref<64x64xf32, #tpu.memory_space<vmem>>, vector<64x64xf32>
    %cst = arith.constant dense<0.000000e+00> : vector<64x16xf32>
    %5 = tpu.matmul %4, %1, %cst {dimension_numbers = #tpu.dot_dimension_numbers<[1], [1], [0], [0], [0, 0, 1, 0], [], []>} : vector<64x64xf32>, vector<16x64xf32>, vector<64x16xf32> -> vector<64x16xf32>
    %6 = vector.extract_strided_slice %2 {offsets = [0, 0], sizes = [64, 1], strides = [1, 1]} : vector<64x3xf32> to vector<64x1xf32>
    %7 = vector.broadcast %6 : vector<64x1xf32> to vector<64x16xf32>
    %8 = arith.addf %5, %7 : vector<64x16xf32>
    %cst_8 = arith.constant 0.353553385 : f32
    %9 = vector.broadcast %cst_8 : f32 to vector<64x16xf32>
    %10 = arith.mulf %8, %9 : vector<64x16xf32>
    %c0_9 = arith.constant 0 : index
    %c0_10 = arith.constant 0 : index
    %11 = vector.load %arg3[%c0_9, %c0_10] : memref<64x64xf32, #tpu.memory_space<vmem>>, vector<64x64xf32>
    %cst_11 = arith.constant dense<0.000000e+00> : vector<64x16xf32>
    %12 = tpu.matmul %11, %1, %cst_11 {dimension_numbers = #tpu.dot_dimension_numbers<[1], [1], [0], [0], [0, 0, 1, 0], [], []>} : vector<64x64xf32>, vector<16x64xf32>, vector<64x16xf32> -> vector<64x16xf32>
    %13 = vector.extract_strided_slice %2 {offsets = [0, 1], sizes = [64, 1], strides = [1, 1]} : vector<64x3xf32> to vector<64x1xf32>
    %14 = vector.broadcast %13 : vector<64x1xf32> to vector<64x16xf32>
    %15 = arith.addf %12, %14 : vector<64x16xf32>
    %c0_12 = arith.constant 0 : index
    %c0_13 = arith.constant 0 : index
    %16 = vector.load %arg4[%c0_12, %c0_13] : memref<64x64xf32, #tpu.memory_space<vmem>>, vector<64x64xf32>
    %cst_14 = arith.constant dense<0.000000e+00> : vector<64x16xf32>
    %17 = tpu.matmul %16, %1, %cst_14 {dimension_numbers = #tpu.dot_dimension_numbers<[1], [1], [0], [0], [0, 0, 1, 0], [], []>} : vector<64x64xf32>, vector<16x64xf32>, vector<64x16xf32> -> vector<64x16xf32>
    %18 = vector.extract_strided_slice %2 {offsets = [0, 2], sizes = [64, 1], strides = [1, 1]} : vector<64x3xf32> to vector<64x1xf32>
    %19 = vector.broadcast %18 : vector<64x1xf32> to vector<64x16xf32>
    %20 = arith.addf %17, %19 : vector<64x16xf32>
    %21 = vector.shape_cast %10 : vector<64x16xf32> to vector<8x8x16xf32>
    %22 = vector.shape_cast %15 : vector<64x16xf32> to vector<8x8x16xf32>
    %23 = vector.shape_cast %20 : vector<64x16xf32> to vector<8x8x16xf32>
    %cst_15 = arith.constant dense<0.000000e+00> : vector<8x16x16xf32>
    %24 = tpu.matmul %21, %22, %cst_15 {dimension_numbers = #tpu.dot_dimension_numbers<[1], [1], [2], [2], [0, 0, 0, 2, 1, 2], [0], [0]>} : vector<8x8x16xf32>, vector<8x8x16xf32>, vector<8x16x16xf32> -> vector<8x16x16xf32>
    %cst_16 = arith.constant dense<0xFF800000> : vector<8x16xf32>
    %25 = vector.multi_reduction <maximumf>, %24, %cst_16 [2] : vector<8x16x16xf32> to vector<8x16xf32>
    %26 = vector.shape_cast %25 : vector<8x16xf32> to vector<8x16x1xf32>
    %27 = vector.broadcast %26 : vector<8x16x1xf32> to vector<8x16x16xf32>
    %28 = arith.subf %24, %27 : vector<8x16x16xf32>
    %29 = math.exp %28 : vector<8x16x16xf32>
    %cst_17 = arith.constant dense<0.000000e+00> : vector<8x16xf32>
    %30 = vector.multi_reduction <add>, %29, %cst_17 [2] : vector<8x16x16xf32> to vector<8x16xf32>
    %31 = vector.shape_cast %30 : vector<8x16xf32> to vector<8x16x1xf32>
    %32 = tpu.reciprocal %31 : vector<8x16x1xf32> -> vector<8x16x1xf32>
    %33 = vector.broadcast %32 : vector<8x16x1xf32> to vector<8x16x16xf32>
    %34 = arith.mulf %29, %33 : vector<8x16x16xf32>
    %cst_18 = arith.constant dense<0.000000e+00> : vector<8x8x16xf32>
    %35 = tpu.matmul %23, %34, %cst_18 {dimension_numbers = #tpu.dot_dimension_numbers<[2], [2], [1], [1], [0, 0, 0, 1, 1, 1], [0], [0]>} : vector<8x8x16xf32>, vector<8x16x16xf32>, vector<8x8x16xf32> -> vector<8x8x16xf32>
    %36 = vector.shape_cast %35 : vector<8x8x16xf32> to vector<64x16xf32>
    %37 = tpu.transpose %36, [1, 0] : vector<64x16xf32> -> vector<16x64xf32>
    %c0_19 = arith.constant 0 : index
    %c0_20 = arith.constant 0 : index
    %38 = vector.load %arg5[%c0_19, %c0_20] : memref<64x64xf32, #tpu.memory_space<vmem>>, vector<64x64xf32>
    %cst_21 = arith.constant dense<0.000000e+00> : vector<16x64xf32>
    %39 = tpu.matmul %37, %38, %cst_21 {dimension_numbers = #tpu.dot_dimension_numbers<[1], [1], [0], [0], [0, 0, 1, 0], [], []>} : vector<16x64xf32>, vector<64x64xf32>, vector<16x64xf32> -> vector<16x64xf32>
    %40 = vector.extract_strided_slice %3 {offsets = [0, 0], sizes = [1, 64], strides = [1, 1]} : vector<6x64xf32> to vector<1x64xf32>
    %41 = vector.broadcast %40 : vector<1x64xf32> to vector<16x64xf32>
    %42 = arith.addf %39, %41 : vector<16x64xf32>
    %43 = arith.addf %1, %42 : vector<16x64xf32>
    %44 = vector.extract_strided_slice %3 {offsets = [1, 0], sizes = [1, 64], strides = [1, 1]} : vector<6x64xf32> to vector<1x64xf32>
    %45 = vector.extract_strided_slice %3 {offsets = [2, 0], sizes = [1, 64], strides = [1, 1]} : vector<6x64xf32> to vector<1x64xf32>
    %cst_22 = arith.constant dense<0.000000e+00> : vector<16xf32>
    %46 = vector.multi_reduction <add>, %43, %cst_22 [1] : vector<16x64xf32> to vector<16xf32>
    %47 = vector.shape_cast %46 : vector<16xf32> to vector<16x1xf32>
    %cst_23 = arith.constant 6.400000e+01 : f32
    %48 = vector.broadcast %cst_23 : f32 to vector<16x1xf32>
    %49 = arith.divf %47, %48 : vector<16x1xf32>
    %50 = vector.broadcast %49 : vector<16x1xf32> to vector<16x64xf32>
    %51 = arith.subf %43, %50 : vector<16x64xf32>
    %52 = arith.mulf %51, %51 : vector<16x64xf32>
    %cst_24 = arith.constant dense<0.000000e+00> : vector<16xf32>
    %53 = vector.multi_reduction <add>, %52, %cst_24 [1] : vector<16x64xf32> to vector<16xf32>
    %54 = vector.shape_cast %53 : vector<16xf32> to vector<16x1xf32>
    %cst_25 = arith.constant 6.400000e+01 : f32
    %55 = vector.broadcast %cst_25 : f32 to vector<16x1xf32>
    %56 = arith.divf %54, %55 : vector<16x1xf32>
    %57 = vector.broadcast %49 : vector<16x1xf32> to vector<16x64xf32>
    %58 = arith.subf %43, %57 : vector<16x64xf32>
    %cst_26 = arith.constant 9.99999974E-6 : f32
    %59 = vector.broadcast %cst_26 : f32 to vector<16x1xf32>
    %60 = arith.addf %56, %59 : vector<16x1xf32>
    %61 = math.rsqrt %60 : vector<16x1xf32>
    %62 = vector.broadcast %61 : vector<16x1xf32> to vector<16x64xf32>
    %63 = arith.mulf %58, %62 : vector<16x64xf32>
    %64 = vector.broadcast %44 : vector<1x64xf32> to vector<16x64xf32>
    %65 = arith.mulf %63, %64 : vector<16x64xf32>
    %66 = vector.broadcast %45 : vector<1x64xf32> to vector<16x64xf32>
    %67 = arith.addf %65, %66 : vector<16x64xf32>
    %c0_27 = arith.constant 0 : index
    %c0_28 = arith.constant 0 : index
    %68 = vector.load %arg6[%c0_27, %c0_28] : memref<128x64xf32, #tpu.memory_space<vmem>>, vector<128x64xf32>
    %cst_29 = arith.constant dense<0.000000e+00> : vector<16x128xf32>
    %69 = tpu.matmul %67, %68, %cst_29 {dimension_numbers = #tpu.dot_dimension_numbers<[1], [1], [0], [0], [0, 0, 1, 0], [], []>} : vector<16x64xf32>, vector<128x64xf32>, vector<16x128xf32> -> vector<16x128xf32>
    %c0_30 = arith.constant 0 : index
    %c0_31 = arith.constant 0 : index
    %70 = vector.load %arg10[%c0_30, %c0_31] : memref<1x128xf32, #tpu.memory_space<vmem>>, vector<1x128xf32>
    %71 = vector.broadcast %70 : vector<1x128xf32> to vector<16x128xf32>
    %72 = arith.addf %69, %71 : vector<16x128xf32>
    %cst_32 = arith.constant 0.000000e+00 : f32
    %73 = vector.broadcast %cst_32 : f32 to vector<16x128xf32>
    %74 = arith.maximumf %72, %73 : vector<16x128xf32>
    %c0_33 = arith.constant 0 : index
    %c0_34 = arith.constant 0 : index
    %75 = vector.load %arg7[%c0_33, %c0_34] : memref<64x128xf32, #tpu.memory_space<vmem>>, vector<64x128xf32>
    %cst_35 = arith.constant dense<0.000000e+00> : vector<16x64xf32>
    %76 = tpu.matmul %74, %75, %cst_35 {dimension_numbers = #tpu.dot_dimension_numbers<[1], [1], [0], [0], [0, 0, 1, 0], [], []>} : vector<16x128xf32>, vector<64x128xf32>, vector<16x64xf32> -> vector<16x64xf32>
    %77 = vector.extract_strided_slice %3 {offsets = [3, 0], sizes = [1, 64], strides = [1, 1]} : vector<6x64xf32> to vector<1x64xf32>
    %78 = vector.broadcast %77 : vector<1x64xf32> to vector<16x64xf32>
    %79 = arith.addf %76, %78 : vector<16x64xf32>
    %80 = arith.addf %67, %79 : vector<16x64xf32>
    %81 = vector.extract_strided_slice %3 {offsets = [4, 0], sizes = [1, 64], strides = [1, 1]} : vector<6x64xf32> to vector<1x64xf32>
    %82 = vector.extract_strided_slice %3 {offsets = [5, 0], sizes = [1, 64], strides = [1, 1]} : vector<6x64xf32> to vector<1x64xf32>
    %cst_36 = arith.constant dense<0.000000e+00> : vector<16xf32>
    %83 = vector.multi_reduction <add>, %80, %cst_36 [1] : vector<16x64xf32> to vector<16xf32>
    %84 = vector.shape_cast %83 : vector<16xf32> to vector<16x1xf32>
    %cst_37 = arith.constant 6.400000e+01 : f32
    %85 = vector.broadcast %cst_37 : f32 to vector<16x1xf32>
    %86 = arith.divf %84, %85 : vector<16x1xf32>
    %87 = vector.broadcast %86 : vector<16x1xf32> to vector<16x64xf32>
    %88 = arith.subf %80, %87 : vector<16x64xf32>
    %89 = arith.mulf %88, %88 : vector<16x64xf32>
    %cst_38 = arith.constant dense<0.000000e+00> : vector<16xf32>
    %90 = vector.multi_reduction <add>, %89, %cst_38 [1] : vector<16x64xf32> to vector<16xf32>
    %91 = vector.shape_cast %90 : vector<16xf32> to vector<16x1xf32>
    %cst_39 = arith.constant 6.400000e+01 : f32
    %92 = vector.broadcast %cst_39 : f32 to vector<16x1xf32>
    %93 = arith.divf %91, %92 : vector<16x1xf32>
    %94 = vector.broadcast %86 : vector<16x1xf32> to vector<16x64xf32>
    %95 = arith.subf %80, %94 : vector<16x64xf32>
    %cst_40 = arith.constant 9.99999974E-6 : f32
    %96 = vector.broadcast %cst_40 : f32 to vector<16x1xf32>
    %97 = arith.addf %93, %96 : vector<16x1xf32>
    %98 = math.rsqrt %97 : vector<16x1xf32>
    %99 = vector.broadcast %98 : vector<16x1xf32> to vector<16x64xf32>
    %100 = arith.mulf %95, %99 : vector<16x64xf32>
    %101 = vector.broadcast %81 : vector<1x64xf32> to vector<16x64xf32>
    %102 = arith.mulf %100, %101 : vector<16x64xf32>
    %103 = vector.broadcast %82 : vector<1x64xf32> to vector<16x64xf32>
    %104 = arith.addf %102, %103 : vector<16x64xf32>
    %c0_41 = arith.constant 0 : index
    %c0_42 = arith.constant 0 : index
    %c0_43 = arith.constant 0 : index
    %105 = vector.load %arg11[%c0_41, %c0_42, %c0_43] : memref<1x16x64xf32, #tpu.memory_space<vmem>>, vector<1x16x64xf32>
    %106 = vector.shape_cast %105 : vector<1x16x64xf32> to vector<16x64xf32>
    %107 = vector.shape_cast %104 : vector<16x64xf32> to vector<1x16x64xf32>
    tpu.vector_store %arg11[%c0_41, %c0_42, %c0_43], %107 {strides = array<i32>} : memref<1x16x64xf32, #tpu.memory_space<vmem>>, vector<1x16x64xf32>,
    return
  }
  func.func @transform_0(%arg0: i32) -> (i32, i32, i32) {
    %c0_i32 = arith.constant 0 : i32
    %c0_i32_0 = arith.constant 0 : i32
    %c0_i32_1 = arith.constant 0 : i32
    return %arg0, %c0_i32, %c0_i32_0 : i32, i32, i32
  }
  func.func @transform_1(%arg0: i32) -> (i32, i32) {
    %c0_i32 = arith.constant 0 : i32
    %c0_i32_0 = arith.constant 0 : i32
    %c0_i32_1 = arith.constant 0 : i32
    return %c0_i32, %c0_i32_0 : i32, i32
  }
  func.func @transform_2(%arg0: i32) -> (i32, i32) {
    %c0_i32 = arith.constant 0 : i32
    %c0_i32_0 = arith.constant 0 : i32
    %c0_i32_1 = arith.constant 0 : i32
    return %c0_i32, %c0_i32_0 : i32, i32
  }
  func.func @transform_3(%arg0: i32) -> (i32, i32) {
    %c0_i32 = arith.constant 0 : i32
    %c0_i32_0 = arith.constant 0 : i32
    %c0_i32_1 = arith.constant 0 : i32
    return %c0_i32, %c0_i32_0 : i32, i32
  }
  func.func @transform_4(%arg0: i32) -> (i32, i32) {
    %c0_i32 = arith.constant 0 : i32
    %c0_i32_0 = arith.constant 0 : i32
    %c0_i32_1 = arith.constant 0 : i32
    return %c0_i32, %c0_i32_0 : i32, i32
  }
  func.func @transform_5(%arg0: i32) -> (i32, i32) {
    %c0_i32 = arith.constant 0 : i32
    %c0_i32_0 = arith.constant 0 : i32
    %c0_i32_1 = arith.constant 0 : i32
    return %c0_i32, %c0_i32_0 : i32, i32
  }
  func.func @transform_6(%arg0: i32) -> (i32, i32) {
    %c0_i32 = arith.constant 0 : i32
    %c0_i32_0 = arith.constant 0 : i32
    %c0_i32_1 = arith.constant 0 : i32
    return %c0_i32, %c0_i32_0 : i32, i32
  }
  func.func @transform_7(%arg0: i32) -> (i32, i32) {
    %c0_i32 = arith.constant 0 : i32
    %c0_i32_0 = arith.constant 0 : i32
    %c0_i32_1 = arith.constant 0 : i32
    return %c0_i32, %c0_i32_0 : i32, i32
  }
  func.func @transform_8(%arg0: i32) -> (i32, i32) {
    %c0_i32 = arith.constant 0 : i32
    %c0_i32_0 = arith.constant 0 : i32
    %c0_i32_1 = arith.constant 0 : i32
    return %c0_i32, %c0_i32_0 : i32, i32
  }
  func.func @transform_9(%arg0: i32) -> (i32, i32) {
    %c0_i32 = arith.constant 0 : i32
    %c0_i32_0 = arith.constant 0 : i32
    %c0_i32_1 = arith.constant 0 : i32
    return %c0_i32, %c0_i32_0 : i32, i32
  }
  func.func @transform_10(%arg0: i32) -> (i32, i32, i32) {
    %c0_i32 = arith.constant 0 : i32
    %c0_i32_0 = arith.constant 0 : i32
    %c0_i32_1 = arith.constant 0 : i32
    return %arg0, %c0_i32, %c0_i32_0 : i32, i32, i32
  }
}

</mosaic_0001>

<bundles_post_ra>
// kernel: tpu_custom_call.1
= control target key start
LH: loop header
LB: loop body
LE: loop exit
PB: predicated region body
PF: predicated region fallthrough
CT: control target
= control target key end

     0   :  { %s4788_s0 = inlined_call_operand.hbm [shape: f32[2,16,64], index: 0, kind: input, shape index: {}]   ;;  %s4789_s1 = inlined_call_operand.vmem [shape: f32[64,64], index: 1, kind: input, shape index: {}]   ;;  %s4790_s2 = inlined_call_operand.vmem [shape: f32[64,64], index: 2, kind: input, shape index: {}]   ;;  %s4791_s3 = inlined_call_operand.vmem [shape: f32[64,64], index: 3, kind: input, shape index: {}]   ;;  %s4792_s4 = inlined_call_operand.vmem [shape: f32[64,64], index: 4, kind: input, shape index: {}]   ;;  %s4793_s5 = inlined_call_operand.vmem [shape: f32[128,64], index: 5, kind: input, shape index: {}]   ;;  %s4794_s6 = inlined_call_operand.hbm [shape: f32[64,128], index: 6, kind: input, shape index: {}]   ;;  %s4795_s7 = inlined_call_operand.vmem [shape: f32[64,3], index: 7, kind: input, shape index: {}]   ;;  %s4796_s8 = inlined_call_operand.vmem [shape: f32[6,64], index: 8, kind: input, shape index: {}]   ;;  %s4797_s9 = inlined_call_operand.vmem [shape: f32[1,128], index: 9, kind: input, shape index: {}]   ;;  %s4798_s10 = inlined_call_operand.hbm [shape: f32[2,16,64], index: 10, kind: output, shape index: {}]  }
   0x1   :  { %4809 = sst [smem:[#allocation14_spill]] %s4794_s6 }
   0x2   :  { %15 = vsyncpa [#allocation3], 0 }
   0x3   :  { %17 = vsyncpa [#allocation3 + $0x1], 0 }
   0x4   :  { %18 = vsyncpa [#allocation6], 0 }
   0x5   :  { %19 = vsyncpa [#allocation4], 0 }
   0x6   :  { %21 = vsyncpa [#allocation4 + $0x1], 0  ;;  %s4005_s13 = smov 0   ;;  %s4007_s14 = smov 0  }
   0x7   :  { %s4009_s15 = smov 0   ;;  %s4011_s16 = smov 0  }
   0x8 LB: > { %4810 = sst [smem:[#allocation11_spill]] %s3924_s13  ;;  %s4026_s17 = sadd.s32 4294967295, %s3936_s16   ;;  %s3936_s16 = sphi %s4011_s16, %s4832_s16   ;;  %s3932_s15 = sphi %s4009_s15, %s4835_s15   ;;  %s3928_s14 = sphi %s4007_s14, %s4834_s14   ;;  %s3924_s13 = sphi %s4005_s13, %s4833_s13  }
   0x9   : > { %s3218_s18 = sadd.s32 4294967294, %s3936_s16   ;;  %p47_p0 = scmp.ne.s32.totalorder %s3928_s14, %s3924_s13 }
   0xa   : > { %p4804_p1 = scmp.eq.s32.totalorder %s4026_s17, 0  ;;  %p266_p3 = scmp.eq.s32.totalorder %s3218_s18, 1 }
   0xb   : > { %p3219_p5 = scmp.ge.s32.totalorder %s3936_s16, 1  ;;  %p273_p7 = scmp.lt.s32.totalorder %s3936_s16, 3 }
   0xc   : > { %p4035_p4 = por %p4804_p1, %p47_p0  ;;  %p4040_p6 = por %p266_p3, %p47_p0 }
   0xd   : > { %p4045_p8 = pnand %p3219_p5, %p273_p7  ;;  %s3938_s22 = smov [#allocation5]  }
   0xe   : > { %s4811_s19 = scalar_select %p4035_p4, 1, 0 }
   0xf   : > { %s4812_s20 = scalar_select %p4040_p6, 1, 0 }
  0x10   : > { %s4814_s21 = scalar_select %p4045_p8, 1, 0 }
  0x11   : > { %4813 = sst [smem:[#allocation12_spill]] %s4812_s20  ;;  %s300_s23 = sshll.u32 %s3938_s22, 4  ;;  %s301_s23 = int_to_ptr.vmem [resolvable:$true] %s300_s23 }
  0x12   : > { %p3676_p9 = pneg %p4045_p8  ;;  %s4059_s25 = sadd.s32 1, %s3936_s16  }
  0x13   : > { %4816 = sst [smem:[#allocation13_spill]] %s4059_s25  ;;  %s34_s26 = sadd.s32 1, %s3932_s15 }
  0x14   : > { %p4054_p11 = pnand %p3676_p9, %p4804_p1  ;;  %s31_s27 = ssub.s32 %s3936_s16, %s4059_s25 }
  0x15   : > { %s3825_s28 = scalar_lea.vmem %s301_s23, 1024  ;;  %p3833_p5 = scmp.lt.s32.totalorder %s301_s23, %s301_s23 }
  0x16   : > { %p3816_p12 = pneg %p4054_p11  ;;  %p3826_p13 = scmp.ne.s32.totalorder %s301_s23, %s3825_s28 }
  0x17   : > { %p3834_p7 = scmp.lt.s32.totalorder %s3825_s28, %s3825_s28 }
  0x18   : > { %p3828_p0 = pnand %p3826_p13, %p3816_p12 }
  0x19   : > { %p3835_p10 = por %p3834_p7, %p3833_p5 }
  0x1a   : > { %p3829_p3 = pneg %p3828_p0 }
  0x1c   : > { %p3836_p2 = pnand %p3835_p10, %p3829_p3 }
  0x1e   : > { %3839 = shalt.err (!%p3836_p2)
}
  0x1f   : > { %s4803_s29 = smov 128   ;;  %s4805_s30 = smov 8  }
  0x20   : > { %s4817_s6 = sld [smem:[#allocation14_spill]]  ;;  %p32_p2 = scmp.eq.s32.totalorder %s31_s27, 0 }
  0x21   : > { %p41_p9 = scmp.ne.s32.totalorder %s3932_s15, %s3928_s14  ;;  %p42_p10 = scmp.eq.s32.totalorder %s3936_s16, 0 }
  0x22   : > { %p3689_p12 = scmp.lt.s32.totalorder %s3936_s16, 2  ;;  %p4818_p0 = scmp.eq.s32.totalorder %s4026_s17, 1 }
  0x23   : > { %s4079_s18 = scalar_select %p32_p2, %s3932_s15, %s34_s26  }
  0x24   : > { %p43_p13 = por %p42_p10, %p41_p9  ;;  %p4083_p3 = por %p4818_p0, %p41_p9 }
  0x25   : > { %s323_s24 = sand.u32 1, %s3932_s15   ;;  %s3333_s28 = sshll.u32 %s3936_s16, 8 }
  0x26   : > { %3679 = dma.hbm_to_vmem [thread:$0]  (!%p4054_p11), %s4817_s6, 1024, %s301_s23, [#allocation6], %s4803_s29, %s4803_s29, %s4805_s30  }
  0x27   : > { %s4819_s22 = scalar_select %p4083_p3, 1, 0 }
  0x28   : > { %s3222_s25 = sshll.u32 %s323_s24, 4  ;;  %s4092_s11 = scalar_lea.hbm %s4788_s0, %s3333_s28 }
  0x29   : > { %s327_s23 = scalar_lea.vmem [#allocation2], %s3222_s25  ;;  %p4094_p11 = pnand %p3689_p12, %p43_p13 }
  0x2a   : > { %s334_s26 = sshll.u32 %s327_s23, 4  ;;  %s4100_s12 = scalar_lea.sflag [#allocation3], %s323_s24  ;;  %s4098_s26 = int_to_ptr.vmem [resolvable:$true] %s334_s26 }
  0x2b   : > { %s3840_s29 = scalar_lea.hbm %s4092_s11, 256  ;;  %p3842_p7 = pneg %p4094_p11 }
  0x2c   : > { %p3841_p5 = scmp.ne.s32.totalorder %s4092_s11, %s3840_s29  ;;  %s3845_s25 = scalar_lea.hbm %s4788_s0, 512 }
  0x2d   : > { %p3846_p10 = scmp.lt.s32.totalorder %s4092_s11, %s4788_s0  ;;  %p3847_p12 = scmp.lt.s32.totalorder %s3845_s25, %s3840_s29 }
  0x2e   : > { %p3843_p2 = pnand %p3842_p7, %p3841_p5 }
  0x2f   : > { %p3848_p13 = por %p3847_p12, %p3846_p10 }
  0x30   : > { %p3844_p9 = pneg %p3843_p2 }
  0x32   : > { %p3849_p0 = pnand %p3848_p13, %p3844_p9 }
  0x34   : > { %3852 = shalt.err (!%p3849_p0)
}
  0x35   : > { %s3853_s24 = scalar_lea.vmem %s4098_s26, 256  ;;  %s3941_s30 = smov [#allocation2]  }
  0x36   : > { %p3854_p1 = scmp.ne.s32.totalorder %s4098_s26, %s3853_s24  ;;  %s3858_s6 = sshll.u32 %s3941_s30, 4  ;;  %s3859_s6 = int_to_ptr.vmem [resolvable:$false] %s3858_s6 }
  0x37   : > { %s3860_s13 = scalar_lea.vmem %s3859_s6, 512  ;;  %p3861_p2 = scmp.lt.s32.totalorder %s4098_s26, %s3859_s6 }
  0x38   : > { %p3856_p6 = pnand %p3854_p1, %p3842_p7  ;;  %p3862_p3 = scmp.lt.s32.totalorder %s3860_s13, %s3853_s24 }
  0x3a   : > { %p3857_p5 = pneg %p3856_p6  ;;  %p3863_p4 = por %p3862_p3, %p3861_p2 }
  0x3c   : > { %p3864_p8 = pnand %p3863_p4, %p3857_p5 }
  0x3e   : > { %3867 = shalt.err (!%p3864_p8)
}
  0x3f   : > { %s4821_s29 = smov 8   ;;  %s4822_s20 = smov 128  }
  0x40   : > { %3683 = dma.hbm_to_vmem [thread:$0]  (!%p4094_p11), %s4092_s11, 256, %s4098_s26, %s4100_s12, %s4822_s20, %s4822_s20, %s4821_s29  }
  0x41   : > { %p4823_p1 = scmp.ne.s32.totalorder %s4814_s21, 0 }
  0x42   : > { %s4127_s30 = sand.u32 (!%p4823_p1), 1, %s3928_s14   ;;  %p4824_p4 = scmp.ne.s32.totalorder (!%p4823_p1), %s4811_s19, 0 }
  0x43   : > { %346 = sbr.rel (%p4823_p1) target bundleno = 2492 (0x9bc), region = 60  ;;  %s3226_s6 = sshll.u32 (!%p4823_p1), %s4127_s30, 4 }
  0x44   : > { %s349_s25 = scalar_lea.sflag (!%p4823_p1), [#allocation3], %s4127_s30  ;;  %s4133_s27 = scalar_lea.vmem (!%p4823_p1), [#allocation2], %s3226_s6 }
  0x48   : > { %3911 = dma.done.wait (%p4824_p4), %s349_s25, 256  }
  0x49   : > { %3913 = vsyncadd (%p4824_p4), %s349_s25, 4294967040  ;;  %p4825_p6 = scmp.eq.s32.totalorder %s4026_s17, 0 }
  0x4b   : > { %3915 = dma.done.wait (%p4825_p6), [#allocation6], 1024   ;;  %p4826_p8 = pmov %p4825_p6 }
  0x4c   : > { %v3942_v0 = vmov 0   ;;  %vm452_vm0 = vcmask 523264   ;;  %v394_v1 = vld [vmem:[%s4133_s27 + $0x8] sm:$0xff]  ;;  %v393_v2 = vld [vmem:[%s4133_s27] sm:$0xff]  ;;  %v3943_v27 = vmov 1   ;;  %vm966_vm1 = vcmask 64512  }
  0x4d   : > { %3917 = vsyncadd (%p4826_p8), [#allocation6], 4294966272  ;;  %3734 = vset.pattern.permute.xlu0 %v3942_v0  ;;  %3735 = vset.pattern.permute.xlu1 %v3942_v0  ;;  %v404_v3 = vld [vmem:[%s4789_s1] sm:$0xff]  ;;  %v4168_v6 = vld [vmem:[%s4795_s7 + $0x8] sm:$0xff]  ;;  %vm1839_vm2 = vcmask 130048   ;;  %vm3946_vm3 = vmmov 0  }
  0x4e   : > { %3451 = vmatprep.subr.msk.mxu0 %vm452_vm0, %v394_v1  ;;  %3455 = vmatprep.mubr.msk.f32.mxu0 %vm452_vm0, %v404_v3  ;;  %v4157_v4 = vld [vmem:[%s4795_s7] sm:$0xff]  ;;  %v405_v7 = vld [vmem:[%s4789_s1 + $0x8] sm:$0xff]  ;;  %v4177_v8 = vld [vmem:[%s4795_s7 + $0x10] sm:$0xff]  ;;  %s3334_s28 = sshll.u32 %s4026_s17, 8  ;;  %s392_s23 = scalar_lea.vmem [#allocation7], %s3226_s6 }
  0x4f   : > { %3452 = vmatpush3.xpose.msk.msra.mxu0 %vm452_vm0, %v394_v1  ;;  %3467 = vmatprep.subr.msk.mxu1 %vm452_vm0, %v394_v1  ;;  %v596_v5 = vld [vmem:[%s4790_s2] sm:$0xff]  ;;  %v406_v9 = vld [vmem:[%s4789_s1 + $0x10] sm:$0xff]  ;;  %v597_v10 = vld [vmem:[%s4790_s2 + $0x8] sm:$0xff]  ;;  %s3135_s24 = sshll.u32 %s392_s23, 4  ;;  %s4742_s20 = scalar_lea.hbm %s4798_s10, %s3334_s28  ;;  %s4744_s24 = int_to_ptr.vmem [resolvable:$true] %s3135_s24 }
  0x50   : > { %3453 = vmatprep.subr.msk.mxu0 %vm452_vm0, %v393_v2  ;;  %3468 = vmatpush3.xpose.msk.msra.mxu1 %vm452_vm0, %v394_v1  ;;  %v598_v11 = vld [vmem:[%s4790_s2 + $0x10] sm:$0xff]  ;;  %v4194_v12 = vld [vmem:[%s4795_s7 + $0x18] sm:$0xff]  ;;  %v4201_v13 = vld [vmem:[%s4795_s7 + $0x20] sm:$0xff]  ;;  %s3122_s17 = scalar_lea.sflag [#allocation4], %s4127_s30  ;;  %s3868_s25 = scalar_lea.vmem %s4744_s24, 256 }
  0x51   : > { %414 = vperm.xlu0 %3734, %v4157_v4   ;;  %3469 = vmatprep.subr.msk.mxu1 %vm452_vm0, %v393_v2  ;;  %v407_v14 = vld [vmem:[%s4789_s1 + $0x18] sm:$0xff]  ;;  %v408_v15 = vld [vmem:[%s4789_s1 + $0x20] sm:$0xff]  ;;  %v4223_v18 = vld [vmem:[%s4795_s7 + $0x28] sm:$0xff]  ;;  %p3869_p3 = scmp.ne.s32.totalorder %s4744_s24, %s3868_s25  ;;  %p4827_p11 = scmp.ne.s32.totalorder %s4819_s22, 0 }
  0x52   : > { %3471 = vmatprep.mubr.msk.f32.mxu1 %vm452_vm0, %v596_v5  ;;  %424 = vperm.xlu1 %3735, %v4177_v8   ;;  %v599_v16 = vld [vmem:[%s4790_s2 + $0x18] sm:$0xff]  ;;  %v600_v17 = vld [vmem:[%s4790_s2 + $0x20] sm:$0xff]  ;;  %v4230_v19 = vld [vmem:[%s4795_s7 + $0x30] sm:$0xff]  ;;  %s3947_s6 = smov [#allocation7]  }
  0x53   : > { %3454 = vmatpush3.xpose.msk.msra.mxu0 %vm452_vm0, %v393_v2  ;;  %v409_v20 = vld [vmem:[%s4789_s1 + $0x28] sm:$0xff]  ;;  %v410_v21 = vld [vmem:[%s4789_s1 + $0x30] sm:$0xff]  ;;  %v4253_v24 = vld [vmem:[%s4795_s7 + $0x38] sm:$0xff]  ;;  %p3870_p7 = pnand %p3869_p3, %p4827_p11  ;;  %s3872_s21 = sshll.u32 %s3947_s6, 4  ;;  %s3873_s21 = int_to_ptr.vmem [resolvable:$false] %s3872_s21 }
  0x54   : > { %3470 = vmatpush3.xpose.msk.msra.mxu1 %vm452_vm0, %v393_v2  ;;  %3483 = vmatprep.subr.msk.mxu0 %vm452_vm0, %v394_v1  ;;  %v601_v22 = vld [vmem:[%s4790_s2 + $0x28] sm:$0xff]  ;;  %v602_v23 = vld [vmem:[%s4790_s2 + $0x30] sm:$0xff]  ;;  %v411_v25 = vld [vmem:[%s4789_s1 + $0x38] sm:$0xff]  ;;  %s3874_s11 = scalar_lea.vmem %s3873_s21, 512  ;;  %p3875_p10 = scmp.lt.s32.totalorder %s4744_s24, %s3873_s21 }
  0x55   : > { %419 = vperm.xlu0 %3734, %v4168_v6   ;;  %v603_v26 = vld [vmem:[%s4790_s2 + $0x38] sm:$0xff]  ;;  %v765_v28 = vld [vmem:[%s4791_s3] sm:$0xff]  ;;  %v766_v29 = vld [vmem:[%s4791_s3 + $0x8] sm:$0xff]  ;;  %p3871_p9 = pneg %p3870_p7  ;;  %p3876_p12 = scmp.lt.s32.totalorder %s3874_s11, %s3868_s25 }
  0x56   : > { %3456 = vmatmul.mubr.msk.f32.vlgmr.msra.gmra.mxu0 %vm452_vm0, %v405_v7  ;;  %429 = vperm.xlu1 %3735, %v4194_v12   ;;  %v767_v44 = vld [vmem:[%s4791_s3 + $0x10] sm:$0xff]  ;;  %v768_v49 = vld [vmem:[%s4791_s3 + $0x18] sm:$0xff]  ;;  %v769_v55 = vld [vmem:[%s4791_s3 + $0x20] sm:$0xff] }
  0x57   : > { %3458 = vmatprep.mubr.msk.f32.mxu0 %vm452_vm0, %v406_v9  ;;  %3472 = vmatmul.mubr.msk.f32.vlgmr.msra.gmra.mxu1 %vm452_vm0, %v597_v10  ;;  %v770_v60 = vld [vmem:[%s4791_s3 + $0x28] sm:$0xff]  ;;  %v771_v3 = vld [vmem:[%s4791_s3 + $0x30] sm:$0xff]  ;;  %v772_v9 = vld [vmem:[%s4791_s3 + $0x38] sm:$0xff]  ;;  %p3877_p13 = por %p3876_p12, %p3875_p10 }
  0x58   : > { %3474 = vmatprep.mubr.msk.f32.mxu1 %vm452_vm0, %v598_v11  ;;  %3484 = vmatpush3.xpose.msk.msra.mxu0 %vm452_vm0, %v394_v1 }
  0x59   : > { %434 = vperm.xlu0 %3734, %v4201_v13   ;;  %3485 = vmatprep.subr.msk.mxu0 %vm452_vm0, %v393_v2  ;;  %p3878_p0 = pnand %p3877_p13, %p3871_p9 }
  0x5a   : > { %3459 = vmatmul.mubr.msk.f32.gmra.mxu0 %vm452_vm0, %v407_v14  ;;  %439 = vperm.xlu1 %3735, %v4223_v18  }
  0x5b   : > { %3461 = vmatprep.mubr.msk.f32.mxu0 %vm452_vm0, %v408_v15  ;;  %3475 = vmatmul.mubr.msk.f32.gmra.mxu1 %vm452_vm0, %v599_v16 }
  0x5c   : > { %3477 = vmatprep.mubr.msk.f32.mxu1 %vm452_vm0, %v600_v17  ;;  %3486 = vmatpush3.xpose.msk.msra.mxu0 %vm452_vm0, %v393_v2 }
  0x5d   : > { %444 = vperm.xlu0 %3734, %v4230_v19  }
  0x5e   : > { %3462 = vmatmul.mubr.msk.f32.gmra.mxu0 %vm452_vm0, %v409_v20  ;;  %449 = vperm.xlu1 %3735, %v4253_v24  }
  0x5f   : > { %3464 = vmatprep.mubr.msk.f32.mxu0 %vm452_vm0, %v410_v21  ;;  %3478 = vmatmul.mubr.msk.f32.gmra.mxu1 %vm452_vm0, %v601_v22 }
  0x60   : > { %3480 = vmatprep.mubr.msk.f32.mxu1 %vm452_vm0, %v602_v23 }
  0x61   : > { %3736 = vset.pattern.permute.xlu0 %v3943_v27 }
  0x62   : > { %3465 = vmatmul.mubr.msk.f32.gmra.mxu0 %vm452_vm0, %v411_v25  ;;  %605 = vperm.xlu0 %3736, %v4157_v4  }
  0x63   : > { %3481 = vmatmul.mubr.msk.f32.gmra.mxu1 %vm452_vm0, %v603_v26  ;;  %3737 = vset.pattern.permute.xlu1 %v3943_v27 }
  0x64   : > { %609 = vperm.xlu1 %3737, %v4168_v6   ;;  %3487 = vmatprep.mubr.msk.f32.mxu0 %vm452_vm0, %v765_v28 }
  0x66   : > { %617 = vperm.xlu0 %3736, %v4194_v12   ;;  %3488 = vmatmul.mubr.msk.f32.vlgmr.msra.gmra.mxu0 %vm452_vm0, %v766_v29 }
  0x67   : > { %3490 = vmatprep.mubr.msk.f32.mxu0 %vm452_vm0, %v767_v44 }
  0x68   : > { %613 = vperm.xlu1 %3737, %v4177_v8  }
  0x6a   : > { %625 = vperm.xlu0 %3736, %v4223_v18   ;;  %3491 = vmatmul.mubr.msk.f32.gmra.mxu0 %vm452_vm0, %v768_v49 }
  0x6b   : > { %3493 = vmatprep.mubr.msk.f32.mxu0 %vm452_vm0, %v769_v55 }
  0x6c   : > { %621 = vperm.xlu1 %3737, %v4201_v13  }
  0x6e   : > { %633 = vperm.xlu0 %3736, %v4253_v24   ;;  %3494 = vmatmul.mubr.msk.f32.gmra.mxu0 %vm452_vm0, %v770_v60 }
  0x6f   : > { %3496 = vmatprep.mubr.msk.f32.mxu0 %vm452_vm0, %v771_v3 }
  0x70   : > { %629 = vperm.xlu1 %3737, %v4230_v19  }
  0x72   : > { %3497 = vmatmul.mubr.msk.f32.gmra.mxu0 %vm452_vm0, %v772_v9 }
  0xcc   : > { %v415_v31 = vpop.permute.xlu0 %414 }
  0xcd   : > { %v425_v30 = vpop.permute.xlu1 %424 }
  0xd0   : > { %v420_v33 = vpop.permute.xlu0 %419 }
  0xd1   : > { %v430_v32 = vpop.permute.xlu1 %429 }
  0xd4   : > { %v435_v35 = vpop.permute.xlu0 %434 }
  0xd5   : > { %v440_v34 = vpop.permute.xlu1 %439 }
  0xd8   : > { %v445_v38 = vpop.permute.xlu0 %444 }
  0xd9   : > { %v4285_v36 = vpop.permute.xlu1 %449 }
  0xdd   : > { %v606_v40 = vpop.permute.xlu0 %605 }
  0xdf   : > { %v610_v37 = vpop.permute.xlu1 %609 }
  0xe3   : > { %v614_v43 = vpop.permute.xlu1 %613 }
  0xe7   : > { %v622_v59 = vpop.permute.xlu1 %621 }
  0xeb   : > { %v630_v17 = vpop.permute.xlu1 %629 }
 0x116   : > { %v3457_v39 = vpop.f32.mrf.mxu0 }
 0x117   : > { %v555_v41 = vadd.f32 %v3457_v39, %v420_v33  ;;  %v3473_v42 = vpop.f32.mrf.mxu1 }
 0x118   : > { %v549_v45 = vpop.f32.mrf.mxu0  ;;  %v4294_v51 = vadd.f32 %v3473_v42, %v610_v37 }
 0x119   : > { %v589_v46 = vmul.f32 0.35355338, %v555_v41  ;;  %v550_v47 = vadd.f32 %v549_v45, %v415_v31  ;;  %v726_v48 = vpop.f32.mrf.mxu1 }
 0x11a   : > { %v3460_v50 = vpop.f32.mrf.mxu0  ;;  %v727_v52 = vadd.f32 %v726_v48, %v606_v40 }
 0x11b   : > { %v588_v53 = vmul.f32 0.35355338, %v550_v47  ;;  %1048 = vxpose.xlu0.b32.start.end [1/1] (short) (narrow) %v589_v46, 16  ;;  %v4297_v54 = vpop.f32.mrf.mxu1  ;;  %v565_v61 = vadd.f32 %v3460_v50, %v430_v32 }
 0x11c   : > { %v559_v56 = vpop.f32.mrf.mxu0  ;;  %3499 = vmatprep.subr.mxu1 %v727_v52 }
 0x11d   : > { %v560_v57 = vadd.f32 %v559_v56, %v425_v30  ;;  %934 = vxpose.xlu1.b32.start.end [1/1] (short) (narrow) %v588_v53, 16  ;;  %v736_v58 = vpop.f32.mrf.mxu1  ;;  %3500 = vmatpush3.msra.mxu1 %v727_v52  ;;  %v591_v10 = vmul.f32 0.35355338, %v565_v61  ;;  %v618_v30 = vpop.permute.xlu0 %617  ;;  %v3944_v52 = vmov 2  }
 0x11e   : > { %v3463_v62 = vpop.f32.mrf.mxu0  ;;  %v737_v63 = vadd.f32 %v736_v58, %v614_v43  ;;  %3504 = vmatprep.subr.mxu1 %v4294_v51  ;;  %v742_v39 = vadd.f32 %v4297_v54, %v618_v30 }
 0x11f   : > { %v590_v0 = vmul.f32 0.35355338, %v560_v57  ;;  %v3479_v1 = vpop.f32.mrf.mxu1  ;;  %v575_v21 = vadd.f32 %v3463_v62, %v440_v34 }
 0x120   : > { %v569_v2 = vpop.f32.mrf.mxu0 }
 0x121   : > { %v570_v5 = vadd.f32 %v569_v2, %v435_v35  ;;  %1161 = vxpose.xlu0.b32.start.end [1/1] (short) (narrow) %v590_v0, 16  ;;  %v746_v7 = vpop.f32.mrf.mxu1  ;;  %v593_v27 = vmul.f32 0.35355338, %v575_v21  ;;  %v626_v31 = vpop.permute.xlu0 %625 }
 0x122   : > { %v3466_v11 = vpop.f32.mrf.mxu0  ;;  %v747_v14 = vadd.f32 %v746_v7, %v622_v59  ;;  %v752_v42 = vadd.f32 %v3479_v1, %v626_v31 }
 0x123   : > { %v592_v15 = vmul.f32 0.35355338, %v570_v5  ;;  %v3482_v16 = vpop.f32.mrf.mxu1  ;;  %v585_v28 = vadd.f32 %v3466_v11, %v4285_v36 }
 0x124   : > { %v579_v20 = vpop.f32.mrf.mxu0  ;;  %3519 = vmatprep.subr.mxu0 %v747_v14 }
 0x125   : > { %v580_v22 = vadd.f32 %v579_v20, %v445_v38  ;;  %1387 = vxpose.xlu1.b32.start.end [1/1] (short) (narrow) %v592_v15, 16  ;;  %v756_v23 = vpop.f32.mrf.mxu1  ;;  %3520 = vmatpush3.msra.mxu0 %v747_v14  ;;  %v595_v29 = vmul.f32 0.35355338, %v585_v28  ;;  %v634_v32 = vpop.permute.xlu0 %633 }
 0x126   : > { %1274 = vxpose.xlu0.b32.start.end [1/1] (short) (narrow) %v591_v10, 16  ;;  %v757_v25 = vadd.f32 %v756_v23, %v630_v17  ;;  %v762_v46 = vadd.f32 %v3482_v16, %v634_v32  ;;  %v4335_v53 = vpop.f32.mrf.mxu0 }
 0x127   : > { %v594_v26 = vmul.f32 0.35355338, %v580_v22 }
 0x128   : > { %3529 = vmatprep.subr.mxu0 %v757_v25  ;;  %v4337_v54 = vpop.f32.mrf.mxu0 }
 0x12a   : > { %1613 = vxpose.xlu1.b32.start.end [1/1] (short) (narrow) %v594_v26, 16  ;;  %v4339_v55 = vpop.f32.mrf.mxu0 }
 0x12b   : > { %1500 = vxpose.xlu0.b32.start.end [1/1] (short) (narrow) %v593_v27, 16 }
 0x12c   : > { %v4341_v56 = vpop.f32.mrf.mxu0 }
 0x12e   : > { %v4343_v57 = vpop.f32.mrf.mxu0 }
 0x130   : > { %1726 = vxpose.xlu0.b32.start.end [1/1] (short) (narrow) %v595_v29, 16  ;;  %v4348_v61 = vpop.f32.mrf.mxu0 }
 0x132   : > { %v4353_v2 = vpop.f32.mrf.mxu0 }
 0x134   : > { %v4358_v7 = vpop.f32.mrf.mxu0 }
 0x148   : > { %3739 = vset.pattern.permute.xlu1 %v3944_v52 }
 0x159   : > { %3738 = vset.pattern.permute.xlu0 %v3944_v52 }
 0x197   : > { %v1064_v33 = vpop.trf.xlu0 }
 0x199   : > { %v950_v34 = vpop.trf.xlu1 }
 0x19a   : > { %3501 = vmatprep.mubr.msk.f32.mxu1 %vm966_vm1, %v950_v34 }
 0x19b   : > { %v1065_v35 = vpop.trf.xlu0 }
 0x19d   : > { %v951_v37 = vpop.trf.xlu1 }
 0x19e   : > { %3502 = vmatmul.mubr.msk.f32.vlgmr.msra.gmra.mxu1 %vm966_vm1, %v951_v37 }
 0x19f   : > { %3505 = vmatpush3.msra.mxu1 %v4294_v51  ;;  %v1177_v38 = vpop.trf.xlu0  ;;  %3506 = vmatprep.mubr.msk.f32.mxu1 %vm966_vm1, %v1064_v33 }
 0x1a0   : > { %3509 = vmatprep.subr.mxu1 %v737_v63 }
 0x1a1   : > { %v1403_v36 = vpop.trf.xlu1 }
 0x1a2   : > { %3507 = vmatmul.mubr.msk.f32.vlgmr.msra.gmra.mxu1 %vm966_vm1, %v1065_v35  ;;  %3521 = vmatprep.mubr.msk.f32.mxu0 %vm966_vm1, %v1403_v36 }
 0x1a3   : > { %3510 = vmatpush3.msra.mxu1 %v737_v63  ;;  %v1178_v40 = vpop.trf.xlu0  ;;  %3511 = vmatprep.mubr.msk.f32.mxu1 %vm966_vm1, %v1177_v38 }
 0x1a4   : > { %3514 = vmatprep.subr.mxu1 %v742_v39 }
 0x1a5   : > { %v1404_v41 = vpop.trf.xlu1 }
 0x1a6   : > { %3512 = vmatmul.mubr.msk.f32.vlgmr.msra.gmra.mxu1 %vm966_vm1, %v1178_v40  ;;  %3522 = vmatmul.mubr.msk.f32.vlgmr.msra.gmra.mxu0 %vm966_vm1, %v1404_v41 }
 0x1a7   : > { %3515 = vmatpush3.msra.mxu1 %v742_v39  ;;  %3530 = vmatpush3.msra.mxu0 %v757_v25  ;;  %v1290_v43 = vpop.trf.xlu0 }
 0x1a8   : > { %3524 = vmatprep.subr.mxu1 %v752_v42  ;;  %3516 = vmatprep.mubr.msk.f32.mxu1 %vm966_vm1, %v1290_v43 }
 0x1a9   : > { %v1629_v44 = vpop.trf.xlu1 }
 0x1aa   : > { %3531 = vmatprep.mubr.msk.f32.mxu0 %vm966_vm1, %v1629_v44 }
 0x1ab   : > { %v1291_v45 = vpop.trf.xlu0 }
 0x1ac   : > { %3517 = vmatmul.mubr.msk.f32.vlgmr.msra.gmra.mxu1 %vm966_vm1, %v1291_v45 }
 0x1ad   : > { %3525 = vmatpush3.msra.mxu1 %v752_v42  ;;  %v1630_v47 = vpop.trf.xlu1 }
 0x1ae   : > { %3534 = vmatprep.subr.mxu1 %v762_v46  ;;  %3532 = vmatmul.mubr.msk.f32.vlgmr.msra.gmra.mxu0 %vm966_vm1, %v1630_v47 }
 0x1af   : > { %v1516_v48 = vpop.trf.xlu0 }
 0x1b0   : > { %3526 = vmatprep.mubr.msk.f32.mxu1 %vm966_vm1, %v1516_v48 }
 0x1b3   : > { %v1517_v49 = vpop.trf.xlu0 }
 0x1b4   : > { %3527 = vmatmul.mubr.msk.f32.vlgmr.msra.gmra.mxu1 %vm966_vm1, %v1517_v49 }
 0x1b5   : > { %3535 = vmatpush3.msra.mxu1 %v762_v46 }
 0x1b7   : > { %v1742_v50 = vpop.trf.xlu0 }
 0x1b8   : > { %3536 = vmatprep.mubr.msk.f32.mxu1 %vm966_vm1, %v1742_v50 }
 0x1bb   : > { %v1743_v51 = vpop.trf.xlu0 }
 0x1bc   : > { %3537 = vmatmul.mubr.msk.f32.vlgmr.msra.gmra.mxu1 %vm966_vm1, %v1743_v51 }
 0x25e   : > { %v3503_v58 = vpop.f32.mrf.mxu1 }
 0x25f   : > { %v1843_v59 = vsel %vm1839_vm2, %v3503_v58, -inf }
 0x260   : > { %1844 = vmax.xlane.f32.xlu1 %v1843_v59  ;;  %v4346_v60 = vpop.f32.mrf.mxu1 }
 0x261   : > { %v1840_v63 = vsel %vm1839_vm2, %v4346_v60, -inf }
 0x262   : > { %v3508_v62 = vpop.f32.mrf.mxu1 }
 0x263   : > { %v1849_v0 = vsel %vm1839_vm2, %v3508_v62, -inf }
 0x264   : > { %1841 = vmax.xlane.f32.xlu1 %v1840_v63  ;;  %1850 = vmax.xlane.f32.xlu0 %v1849_v0  ;;  %v1152_v1 = vpop.f32.mrf.mxu1 }
 0x265   : > { %v1846_v5 = vsel %vm1839_vm2, %v1152_v1, -inf }
 0x266   : > { %v4355_v3 = vpop.f32.mrf.mxu1  ;;  %v4364_v14 = vpop.f32.mrf.mxu0 }
 0x267   : > { %v1855_v10 = vsel %vm1839_vm2, %v4355_v3, -inf  ;;  %v1867_v16 = vsel %vm1839_vm2, %v4364_v14, -inf }
 0x268   : > { %1847 = vmax.xlane.f32.xlu1 %v1846_v5  ;;  %v4360_v9 = vpop.f32.mrf.mxu1  ;;  %v4375_v22 = vpop.f32.mrf.mxu0 }
 0x269   : > { %v1852_v21 = vsel %vm1839_vm2, %v4360_v9, -inf  ;;  %v1864_v28 = vsel %vm1839_vm2, %v4375_v22, -inf }
 0x26c   : > { %1856 = vmax.xlane.f32.xlu1 %v1855_v10  ;;  %v3518_v11 = vpop.f32.mrf.mxu1 }
 0x26d   : > { %v1861_v15 = vsel %vm1839_vm2, %v3518_v11, -inf }
 0x26e   : > { %1862 = vmax.xlane.f32.xlu0 %v1861_v15  ;;  %v4369_v17 = vpop.f32.mrf.mxu1  ;;  %v4383_v27 = vpop.f32.mrf.mxu0 }
 0x26f   : > { %v1858_v20 = vsel %vm1839_vm2, %v4369_v17, -inf  ;;  %v1879_v30 = vsel %vm1839_vm2, %v4383_v27, -inf }
 0x270   : > { %1868 = vmax.xlane.f32.xlu1 %v1867_v16  ;;  %v4391_v31 = vpop.f32.mrf.mxu0 }
 0x271   : > { %v1876_v34 = vsel %vm1839_vm2, %v4391_v31, -inf }
 0x272   : > { %1859 = vmax.xlane.f32.xlu0 %v1858_v20 }
 0x274   : > { %v4377_v23 = vpop.f32.mrf.mxu1  ;;  %1853 = vmax.xlane.f32.xlu1 %v1852_v21 }
 0x275   : > { %v1873_v25 = vsel %vm1839_vm2, %v4377_v23, -inf }
 0x276   : > { %1874 = vmax.xlane.f32.xlu0 %v1873_v25  ;;  %v4381_v26 = vpop.f32.mrf.mxu1 }
 0x277   : > { %v1870_v29 = vsel %vm1839_vm2, %v4381_v26, -inf }
 0x278   : > { %1865 = vmax.xlane.f32.xlu1 %v1864_v28 }
 0x27a   : > { %1871 = vmax.xlane.f32.xlu0 %v1870_v29 }
 0x27c   : > { %v4393_v32 = vpop.f32.mrf.mxu1  ;;  %1880 = vmax.xlane.f32.xlu1 %v1879_v30 }
 0x27d   : > { %v1885_v33 = vsel %vm1839_vm2, %v4393_v32, -inf }
 0x27e   : > { %1886 = vmax.xlane.f32.xlu0 %v1885_v33  ;;  %v4399_v35 = vpop.f32.mrf.mxu1 }
 0x27f   : > { %v1882_v37 = vsel %vm1839_vm2, %v4399_v35, -inf }
 0x280   : > { %1877 = vmax.xlane.f32.xlu1 %v1876_v34 }
 0x282   : > { %1883 = vmax.xlane.f32.xlu0 %v1882_v37 }
 0x291   : > { %778 = vperm.xlu1 %3739, %v4168_v6  }
 0x295   : > { %782 = vperm.xlu1 %3739, %v4177_v8  }
 0x298   : > { %774 = vperm.xlu0 %3738, %v4157_v4  }
 0x299   : > { %786 = vperm.xlu1 %3739, %v4194_v12  }
 0x29d   : > { %790 = vperm.xlu1 %3739, %v4201_v13  }
 0x2a1   : > { %794 = vperm.xlu1 %3739, %v4223_v18  }
 0x2e9   : > { %v1845_v38 = vpop.xlane.xlu1 %1844 }
 0x2ea   : > { %v1889_v36 = vsub.f32 %v3503_v58, %v1845_v38 }
 0x2ec   : > { %v1906_v39 = vmul.f32 1.442695, %v1889_v36 }
 0x2ed   : > { %v1851_v40 = vpop.xlane.xlu0 %1850  ;;  %v1842_v41 = vpop.xlane.xlu1 %1841 }
 0x2ee   : > { %3740 = vpow2.f32 %v1906_v39  ;;  %v1891_v42 = vsub.f32 %v3508_v62, %v1851_v40  ;;  %v1888_v43 = vsub.f32 %v4346_v60, %v1842_v41 }
 0x2f0   : > { %v1910_v6 = vmul.f32 1.442695, %v1891_v42  ;;  %v1904_v44 = vmul.f32 1.442695, %v1888_v43 }
 0x2f1   : > { %v1848_v8 = vpop.xlane.xlu1 %1847 }
 0x2f2   : > { %3742 = vpow2.f32 %v1910_v6  ;;  %v1890_v4 = vsub.f32 %v1152_v1, %v1848_v8 }
 0x2f3   : > { %3744 = vpow2.f32 %v1904_v44 }
 0x2f4   : > { %v1908_v12 = vmul.f32 1.442695, %v1890_v4 }
 0x2f5   : > { %v1857_v45 = vpop.xlane.xlu1 %1856 }
 0x2f6   : > { %3746 = vpow2.f32 %v1908_v12  ;;  %v1893_v13 = vsub.f32 %v4355_v3, %v1857_v45 }
 0x2f7   : > { %v1863_v18 = vpop.xlane.xlu0 %1862 }
 0x2f8   : > { %v1914_v46 = vmul.f32 1.442695, %v1893_v13  ;;  %v1895_v47 = vsub.f32 %v3518_v11, %v1863_v18 }
 0x2f9   : > { %v1869_v48 = vpop.xlane.xlu1 %1868 }
 0x2fa   : > { %3748 = vpow2.f32 %v1914_v46  ;;  %v1918_v49 = vmul.f32 1.442695, %v1895_v47  ;;  %v1897_v50 = vsub.f32 %v4364_v14, %v1869_v48 }
 0x2fb   : > { %v4412_v51 = vpop.eup %3740  ;;  %v1860_v52 = vpop.xlane.xlu0 %1859 }
 0x2fc   : > { %3750 = vpow2.f32 %v1918_v49  ;;  %v1922_v58 = vmul.f32 1.442695, %v1897_v50  ;;  %v1894_v59 = vsub.f32 %v4369_v17, %v1860_v52  ;;  %v1939_v60 = vsel %vm1839_vm2, %v4412_v51, 0.0 }
 0x2fd   : > { %1940 = vadd.xlane.f32.xlu1 %v1939_v60  ;;  %v1854_v62 = vpop.xlane.xlu1 %1853  ;;  %v3945_v49 = vmov 0.0  }
 0x2fe   : > { %3752 = vpow2.f32 %v1922_v58  ;;  %v1916_v63 = vmul.f32 1.442695, %v1894_v59  ;;  %v1892_v0 = vsub.f32 %v4360_v9, %v1854_v62  ;;  %3539 = vmatprep.subr.mxu0 %v3945_v49  ;;  %3546 = vmatprep.subr.mxu1 %v3945_v49 }
 0x2ff   : > { %v4418_v1 = vpop.eup %3742  ;;  %v1875_v3 = vpop.xlane.xlu0 %1874  ;;  %3543 = vmatprep.mubr.msk.f32.mxu0 %vm3946_vm3, %v3945_v49  ;;  %3550 = vmatprep.mubr.msk.f32.mxu1 %vm3946_vm3, %v3945_v49 }
 0x300   : > { %v4420_v5 = vpop.eup %3744  ;;  %3754 = vpow2.f32 %v1916_v63  ;;  %v1912_v10 = vmul.f32 1.442695, %v1892_v0  ;;  %v1899_v11 = vsub.f32 %v4377_v23, %v1875_v3  ;;  %v1945_v14 = vsel %vm1839_vm2, %v4418_v1, 0.0 }
 0x301   : > { %1946 = vadd.xlane.f32.xlu0 %v1945_v14  ;;  %v1936_v15 = vsel %vm1839_vm2, %v4420_v5, 0.0  ;;  %v1866_v16 = vpop.xlane.xlu1 %1865 }
 0x302   : > { %3756 = vpow2.f32 %v1912_v10  ;;  %v1926_v17 = vmul.f32 1.442695, %v1899_v11  ;;  %1937 = vadd.xlane.f32.xlu1 %v1936_v15  ;;  %v1896_v9 = vsub.f32 %v4375_v22, %v1866_v16 }
 0x303   : > { %v4428_v20 = vpop.eup %3746  ;;  %v1872_v21 = vpop.xlane.xlu0 %1871 }
 0x304   : > { %3758 = vpow2.f32 %v1926_v17  ;;  %v1920_v25 = vmul.f32 1.442695, %v1896_v9  ;;  %v1898_v23 = vsub.f32 %v4381_v26, %v1872_v21  ;;  %v1942_v28 = vsel %vm1839_vm2, %v4428_v20, 0.0 }
 0x305   : > { %1943 = vadd.xlane.f32.xlu0 %v1942_v28  ;;  %v1881_v29 = vpop.xlane.xlu1 %1880 }
 0x306   : > { %3760 = vpow2.f32 %v1920_v25  ;;  %v1924_v30 = vmul.f32 1.442695, %v1898_v23  ;;  %v1901_v33 = vsub.f32 %v4383_v27, %v1881_v29 }
 0x307   : > { %v4434_v34 = vpop.eup %3748  ;;  %v1887_v37 = vpop.xlane.xlu0 %1886 }
 0x308   : > { %3762 = vpow2.f32 %v1924_v30  ;;  %v1930_v22 = vmul.f32 1.442695, %v1901_v33  ;;  %v1903_v38 = vsub.f32 %v4393_v32, %v1887_v37  ;;  %v1951_v36 = vsel %vm1839_vm2, %v4434_v34, 0.0 }
 0x309   : > { %v4439_v26 = vpop.eup %3750  ;;  %1952 = vadd.xlane.f32.xlu1 %v1951_v36  ;;  %v1878_v39 = vpop.xlane.xlu1 %1877 }
 0x30a   : > { %3764 = vpow2.f32 %v1930_v22  ;;  %v1934_v40 = vmul.f32 1.442695, %v1903_v38  ;;  %v1900_v41 = vsub.f32 %v4391_v31, %v1878_v39  ;;  %v1957_v27 = vsel %vm1839_vm2, %v4439_v26, 0.0 }
 0x30b   : > { %v4444_v42 = vpop.eup %3752  ;;  %v1884_v43 = vpop.xlane.xlu0 %1883  ;;  %1958 = vadd.xlane.f32.xlu0 %v1957_v27 }
 0x30c   : > { %3766 = vpow2.f32 %v1934_v40  ;;  %v1928_v32 = vmul.f32 1.442695, %v1900_v41  ;;  %v1902_v6 = vsub.f32 %v4399_v35, %v1884_v43  ;;  %v1963_v44 = vsel %vm1839_vm2, %v4444_v42, 0.0 }
 0x30d   : > { %v4449_v8 = vpop.eup %3754  ;;  %1964 = vadd.xlane.f32.xlu1 %v1963_v44  ;;  %v779_v3 = vpop.permute.xlu1 %778 }
 0x30e   : > { %3768 = vpow2.f32 %v1928_v32  ;;  %v1932_v4 = vmul.f32 1.442695, %v1902_v6  ;;  %v1954_v31 = vsel %vm1839_vm2, %v4449_v8, 0.0  ;;  %v901_v27 = vadd.f32 %v4335_v53, %v779_v3 }
 0x30f   : > { %v4453_v12 = vpop.eup %3756  ;;  %1955 = vadd.xlane.f32.xlu0 %v1954_v31 }
 0x310   : > { %3770 = vpow2.f32 %v1932_v4  ;;  %v1948_v45 = vsel %vm1839_vm2, %v4453_v12, 0.0 }
 0x311   : > { %v4457_v13 = vpop.eup %3758  ;;  %1949 = vadd.xlane.f32.xlu1 %v1948_v45  ;;  %v4493_v10 = vpop.permute.xlu1 %782 }
 0x312   : > { %v1969_v35 = vsel %vm1839_vm2, %v4457_v13, 0.0 }
 0x313   : > { %v4461_v18 = vpop.eup %3760  ;;  %1970 = vadd.xlane.f32.xlu0 %v1969_v35  ;;  %v775_v16 = vpop.permute.xlu0 %774 }
 0x314   : > { %v1960_v46 = vsel %vm1839_vm2, %v4461_v18, 0.0  ;;  %v896_v40 = vadd.f32 %v4337_v54, %v775_v16  ;;  %v2682_v16 = vld [vmem:[%s4792_s4 + $0x10] sm:$0xff] }
 0x315   : > { %v4465_v47 = vpop.eup %3762  ;;  %1961 = vadd.xlane.f32.xlu1 %v1960_v46  ;;  %v4495_v11 = vpop.permute.xlu1 %786 }
 0x316   : > { %v1966_v48 = vsel %vm1839_vm2, %v4465_v47, 0.0  ;;  %v911_v46 = vadd.f32 %v4339_v55, %v4495_v11 }
 0x317   : > { %v4471_v50 = vpop.eup %3764  ;;  %1967 = vadd.xlane.f32.xlu0 %v1966_v48 }
 0x318   : > { %v1975_v52 = vsel %vm1839_vm2, %v4471_v50, 0.0 }
 0x319   : > { %v4475_v58 = vpop.eup %3766  ;;  %1976 = vadd.xlane.f32.xlu1 %v1975_v52  ;;  %v4497_v14 = vpop.permute.xlu1 %790 }
 0x31a   : > { %v1981_v59 = vsel %vm1839_vm2, %v4475_v58, 0.0  ;;  %v916_v3 = vadd.f32 %v4348_v61, %v4497_v14 }
 0x31b   : > { %v4479_v60 = vpop.eup %3768  ;;  %1982 = vadd.xlane.f32.xlu0 %v1981_v59 }
 0x31c   : > { %v1972_v62 = vsel %vm1839_vm2, %v4479_v60, 0.0 }
 0x31d   : > { %v4483_v63 = vpop.eup %3770  ;;  %1973 = vadd.xlane.f32.xlu1 %v1972_v62  ;;  %v4499_v15 = vpop.permute.xlu1 %794 }
 0x31e   : > { %v1978_v0 = vsel %vm1839_vm2, %v4483_v63, 0.0 }
 0x321   : > { %1979 = vadd.xlane.f32.xlu1 %v1978_v0  ;;  %v921_v0 = vadd.f32 %v4343_v57, %v4499_v15 }
 0x331   : > { %802 = vperm.xlu0 %3738, %v4253_v24  }
 0x332   : > { %798 = vperm.xlu1 %3739, %v4230_v19  }
 0x386   : > { %v1941_v17 = vpop.xlane.xlu1 %1940 }
 0x387   : > { %3772 = vrcp.f32 %v1941_v17  ;;  %v2681_v17 = vld [vmem:[%s4792_s4 + $0x8] sm:$0xff] }
 0x38a   : > { %v1947_v9 = vpop.xlane.xlu0 %1946 }
 0x38b   : > { %3774 = vrcp.f32 %v1947_v9  ;;  %v1938_v21 = vpop.xlane.xlu1 %1937 }
 0x38c   : > { %3776 = vrcp.f32 %v1938_v21 }
 0x38e   : > { %v1944_v25 = vpop.xlane.xlu0 %1943 }
 0x38f   : > { %3778 = vrcp.f32 %v1944_v25 }
 0x392   : > { %v1953_v24 = vpop.xlane.xlu1 %1952 }
 0x393   : > { %3780 = vrcp.f32 %v1953_v24  ;;  %v2680_v24 = vld [vmem:[%s4792_s4] sm:$0xff] }
 0x394   : > { %v3773_v19 = vpop.eup %3772  ;;  %v1959_v23 = vpop.xlane.xlu0 %1958 }
 0x395   : > { %3782 = vrcp.f32 %v1959_v23  ;;  %v2001_v28 = vmul.f32 %v3773_v19, %v4412_v51 }
 0x396   : > { %v1965_v29 = vpop.xlane.xlu1 %1964 }
 0x397   : > { %3540 = vmatpush3.xpose.msk.msra.mxu0 %vm1839_vm2, %v2001_v28 }
 0x398   : > { %v3775_v30 = vpop.eup %3774  ;;  %v1956_v33 = vpop.xlane.xlu0 %1955  ;;  %3541 = vmatprep.subr.mxu0 %v3945_v49 }
 0x399   : > { %v3777_v37 = vpop.eup %3776  ;;  %3784 = vrcp.f32 %v1956_v33  ;;  %v2003_v22 = vmul.f32 %v3775_v30, %v4418_v1 }
 0x39a   : > { %v1950_v38 = vpop.xlane.xlu1 %1949  ;;  %v2000_v36 = vmul.f32 %v3777_v37, %v4420_v5 }
 0x39b   : > { %3786 = vrcp.f32 %v1950_v38  ;;  %3547 = vmatpush3.xpose.msk.msra.mxu1 %vm1839_vm2, %v2003_v22 }
 0x39c   : > { %v3779_v39 = vpop.eup %3778  ;;  %3788 = vrcp.f32 %v1965_v29  ;;  %3542 = vmatpush3.xpose.msk.msra.mxu0 %vm1839_vm2, %v2000_v36  ;;  %v1971_v51 = vpop.xlane.xlu0 %1970  ;;  %3548 = vmatprep.subr.mxu1 %v3945_v49 }
 0x39d   : > { %3790 = vrcp.f32 %v1971_v51  ;;  %v2002_v41 = vmul.f32 %v3779_v39, %v4428_v20  ;;  %3553 = vmatprep.subr.mxu0 %v3945_v49 }
 0x39e   : > { %v1962_v1 = vpop.xlane.xlu1 %1961 }
 0x39f   : > { %3544 = vmatmul.mubr.msk.f32.vlgmr.msra.gmra.mxu0 %vm1839_vm2, %v896_v40  ;;  %3549 = vmatpush3.xpose.msk.msra.mxu1 %vm1839_vm2, %v2002_v41  ;;  %3792 = vrcp.f32 %v1962_v1 }
 0x3a0   : > { %v3781_v5 = vpop.eup %3780  ;;  %v1968_v43 = vpop.xlane.xlu0 %1967  ;;  %3560 = vmatprep.subr.mxu1 %v3945_v49  ;;  %3557 = vmatprep.mubr.msk.f32.mxu0 %vm3946_vm3, %v3945_v49 }
 0x3a1   : > { %3794 = vrcp.f32 %v1968_v43  ;;  %v2005_v54 = vmul.f32 %v3781_v5, %v4434_v34  ;;  %v2688_v5 = vlaneseq }
 0x3a2   : > { %v3783_v20 = vpop.eup %3782  ;;  %3551 = vmatmul.mubr.msk.f32.vlgmr.msra.gmra.mxu1 %vm1839_vm2, %v901_v27  ;;  %v1977_v32 = vpop.xlane.xlu1 %1976 }
 0x3a3   : > { %3554 = vmatpush3.xpose.msk.msra.mxu0 %vm1839_vm2, %v2005_v54  ;;  %v2007_v6 = vmul.f32 %v3783_v20, %v4439_v26  ;;  %3564 = vmatprep.mubr.msk.f32.mxu1 %vm3946_vm3, %v3945_v49  ;;  %3796 = vrcp.f32 %v1977_v32  ;;  %v4621_v27 = vshrl.u32 %v2688_v5, 7  ;;  %v4627_v54 = vld [vmem:[%s4796_s8] sm:$0x3f] }
 0x3a4   : > { %v1983_v53 = vpop.xlane.xlu0 %1982  ;;  %3555 = vmatprep.subr.mxu0 %v3945_v49 }
 0x3a5   : > { %3798 = vrcp.f32 %v1983_v53  ;;  %3561 = vmatpush3.xpose.msk.msra.mxu1 %vm1839_vm2, %v2007_v6  ;;  %v2690_v43 = vsub.s32 0, %v4621_v27 }
 0x3a6   : > { %v3785_v44 = vpop.eup %3784  ;;  %v1974_v34 = vpop.xlane.xlu1 %1973  ;;  %3562 = vmatprep.subr.mxu1 %v3945_v49 }
 0x3a7   : > { %v2006_v4 = vmul.f32 %v3785_v44, %v4449_v8  ;;  %3800 = vrcp.f32 %v1974_v34  ;;  %v906_v8 = vadd.f32 %v4341_v56, %v4493_v10  ;;  %v2691_v20 = vrot.slane %v4627_v54, %v2690_v43  ;;  %v3812_v34 = vld [vmem:[%s4133_s27] sm:$0xff]  ;;  %v2993_v43 = vld [vmem:[#allocation5 + $0x8] sm:$0xff] }
 0x3a8   : > { %v3787_v31 = vpop.eup %3786 }
 0x3a9   : > { %v3789_v45 = vpop.eup %3788  ;;  %3563 = vmatpush3.xpose.msk.msra.mxu1 %vm1839_vm2, %v2006_v4  ;;  %v2004_v26 = vmul.f32 %v3787_v31, %v4453_v12 }
 0x3aa   : > { %v3791_v35 = vpop.eup %3790  ;;  %v1980_v48 = vpop.xlane.xlu1 %1979  ;;  %3574 = vmatprep.subr.mxu1 %v3945_v49  ;;  %v2009_v55 = vmul.f32 %v3789_v45, %v4444_v42  ;;  %v3813_v45 = vld [vmem:[%s4133_s27 + $0x8] sm:$0xff] }
 0x3ab   : > { %3802 = vrcp.f32 %v1980_v48  ;;  %3556 = vmatpush3.xpose.msk.msra.mxu0 %vm1839_vm2, %v2004_v26  ;;  %v2011_v52 = vmul.f32 %v3791_v35, %v4457_v13  ;;  %v2852_v48 = vld [vmem:[%s4793_s5 + $0x70] sm:$0xff] }
 0x3ac   : > { %3565 = vmatmul.mubr.msk.f32.vlgmr.msra.gmra.mxu1 %vm1839_vm2, %v911_v46  ;;  %3567 = vmatprep.subr.mxu0 %v3945_v49  ;;  %v3793_v12 = vpop.eup %3792  ;;  %v2853_v46 = vld [vmem:[%s4793_s5 + $0x78] sm:$0xff] }
 0x3ad   : > { %3575 = vmatpush3.xpose.msk.msra.mxu1 %vm1839_vm2, %v2011_v52  ;;  %3578 = vmatprep.mubr.msk.f32.mxu1 %vm3946_vm3, %v3945_v49  ;;  %v2008_v42 = vmul.f32 %v3793_v12, %v4461_v18  ;;  %v2851_v52 = vld [vmem:[%s4793_s5 + $0x68] sm:$0xff]  ;;  %v2849_v12 = vld [vmem:[%s4793_s5 + $0x58] sm:$0xff] }
 0x3ae   : > { %v3795_v59 = vpop.eup %3794  ;;  %3558 = vmatmul.mubr.msk.f32.vlgmr.msra.gmra.mxu0 %vm1839_vm2, %v906_v8  ;;  %3576 = vmatprep.subr.mxu1 %v3945_v49  ;;  %v799_v10 = vpop.permute.xlu1 %798  ;;  %v2850_v8 = vld [vmem:[%s4793_s5 + $0x60] sm:$0xff] }
 0x3af   : > { %3568 = vmatpush3.xpose.msk.msra.mxu0 %vm1839_vm2, %v2009_v55  ;;  %v2010_v56 = vmul.f32 %v3795_v59, %v4465_v47  ;;  %3571 = vmatprep.mubr.msk.f32.mxu0 %vm3946_vm3, %v3945_v49  ;;  %v926_v15 = vadd.f32 %v4358_v7, %v799_v10  ;;  %v2684_v7 = vld [vmem:[%s4792_s4 + $0x20] sm:$0xff]  ;;  %v2848_v55 = vld [vmem:[%s4793_s5 + $0x50] sm:$0xff]  ;;  %v2847_v59 = vld [vmem:[%s4793_s5 + $0x48] sm:$0xff] }
 0x3b0   : > { %3569 = vmatprep.subr.mxu0 %v3945_v49  ;;  %v3797_v13 = vpop.eup %3796 }
 0x3b1   : > { %3577 = vmatpush3.xpose.msk.msra.mxu1 %vm1839_vm2, %v2010_v56  ;;  %v2013_v18 = vmul.f32 %v3797_v13, %v4471_v50  ;;  %v2846_v56 = vld [vmem:[%s4793_s5 + $0x40] sm:$0xff]  ;;  %v2845_v13 = vld [vmem:[%s4793_s5 + $0x38] sm:$0xff] }
 0x3b2   : > { %v3799_v62 = vpop.eup %3798  ;;  %3588 = vmatprep.subr.mxu1 %v3945_v49 }
 0x3b3   : > { %3570 = vmatpush3.xpose.msk.msra.mxu0 %vm1839_vm2, %v2008_v42  ;;  %v2015_v47 = vmul.f32 %v3799_v62, %v4475_v58  ;;  %v803_v58 = vpop.permute.xlu0 %802 }
 0x3b4   : > { %3579 = vmatmul.mubr.msk.f32.vlgmr.msra.gmra.mxu1 %vm1839_vm2, %v921_v0  ;;  %3581 = vmatprep.subr.mxu0 %v3945_v49  ;;  %v3801_v57 = vpop.eup %3800  ;;  %v931_v14 = vadd.f32 %v4353_v2, %v803_v58  ;;  %v2685_v2 = vld [vmem:[%s4792_s4 + $0x28] sm:$0xff] }
 0x3b5   : > { %3589 = vmatpush3.xpose.msk.msra.mxu1 %vm1839_vm2, %v2015_v47  ;;  %3592 = vmatprep.mubr.msk.f32.mxu1 %vm3946_vm3, %v3945_v49  ;;  %v2012_v50 = vmul.f32 %v3801_v57, %v4479_v60  ;;  %v2686_v60 = vld [vmem:[%s4792_s4 + $0x30] sm:$0xff] }
 0x3b6   : > { %3572 = vmatmul.mubr.msk.f32.vlgmr.msra.gmra.mxu0 %vm1839_vm2, %v916_v3  ;;  %3590 = vmatprep.subr.mxu1 %v3945_v49 }
 0x3b7   : > { %3582 = vmatpush3.xpose.msk.msra.mxu0 %vm1839_vm2, %v2013_v18  ;;  %3585 = vmatprep.mubr.msk.f32.mxu0 %vm3946_vm3, %v3945_v49 }
 0x3b8   : > { %v3803_v61 = vpop.eup %3802  ;;  %3583 = vmatprep.subr.mxu0 %v3945_v49  ;;  %v2687_v49 = vld [vmem:[%s4792_s4 + $0x38] sm:$0xff] }
 0x3b9   : > { %v2014_v11 = vmul.f32 %v3803_v61, %v4483_v63  ;;  %v2683_v63 = vld [vmem:[%s4792_s4 + $0x18] sm:$0xff] }
 0x3bb   : > { %3584 = vmatpush3.xpose.msk.msra.mxu0 %vm1839_vm2, %v2012_v50  ;;  %3591 = vmatpush3.xpose.msk.msra.mxu1 %vm1839_vm2, %v2014_v11  ;;  %v2844_v50 = vld [vmem:[%s4793_s5 + $0x30] sm:$0xff]  ;;  %v2843_v11 = vld [vmem:[%s4793_s5 + $0x28] sm:$0xff] }
 0x3bc   : > { %3595 = vmatprep.subr.msk.mxu0 %vm452_vm0, %v2687_v49  ;;  %3614 = vmatprep.subr.msk.mxu1 %vm452_vm0, %v2853_v46 }
 0x3be   : > { %3586 = vmatmul.mubr.msk.f32.vlgmr.msra.gmra.mxu0 %vm1839_vm2, %v926_v15  ;;  %3593 = vmatmul.mubr.msk.f32.vlgmr.msra.gmra.mxu1 %vm1839_vm2, %v931_v14  ;;  %v2842_v14 = vld [vmem:[%s4793_s5 + $0x20] sm:$0xff]  ;;  %v2841_v15 = vld [vmem:[%s4793_s5 + $0x18] sm:$0xff] }
 0x3bf   : > { %3596 = vmatpush3.xpose.msk.msra.mxu0 %vm452_vm0, %v2687_v49  ;;  %3615 = vmatpush3.xpose.msk.msra.mxu1 %vm452_vm0, %v2853_v46  ;;  %v2840_v49 = vld [vmem:[%s4793_s5 + $0x10] sm:$0xff] }
 0x3c0   : > { %3597 = vmatprep.subr.msk.mxu0 %vm452_vm0, %v2686_v60  ;;  %3616 = vmatprep.subr.msk.mxu1 %vm452_vm0, %v2852_v48 }
 0x3c3   : > { %3598 = vmatpush3.xpose.msk.msra.mxu0 %vm452_vm0, %v2686_v60  ;;  %3617 = vmatpush3.xpose.msk.msra.mxu1 %vm452_vm0, %v2852_v48  ;;  %v2839_v60 = vld [vmem:[%s4793_s5 + $0x8] sm:$0xff] }
 0x3c4   : > { %3599 = vmatprep.subr.msk.mxu0 %vm452_vm0, %v2685_v2  ;;  %3618 = vmatprep.subr.msk.mxu1 %vm452_vm0, %v2851_v52 }
 0x3c7   : > { %3600 = vmatpush3.xpose.msk.msra.mxu0 %vm452_vm0, %v2685_v2  ;;  %3619 = vmatpush3.xpose.msk.msra.mxu1 %vm452_vm0, %v2851_v52  ;;  %v2838_v2 = vld [vmem:[%s4793_s5] sm:$0xff] }
 0x3c8   : > { %3601 = vmatprep.subr.msk.mxu0 %vm452_vm0, %v2684_v7  ;;  %3620 = vmatprep.subr.msk.mxu1 %vm452_vm0, %v2850_v8 }
 0x3cb   : > { %3602 = vmatpush3.xpose.msk.msra.mxu0 %vm452_vm0, %v2684_v7  ;;  %3621 = vmatpush3.xpose.msk.msra.mxu1 %vm452_vm0, %v2850_v8  ;;  %v2999_v7 = vld [vmem:[#allocation5 + $0x38] sm:$0xff] }
 0x3cc   : > { %3603 = vmatprep.subr.msk.mxu0 %vm452_vm0, %v2683_v63  ;;  %3622 = vmatprep.subr.msk.mxu1 %vm452_vm0, %v2849_v12 }
 0x3cf   : > { %3604 = vmatpush3.xpose.msk.msra.mxu0 %vm452_vm0, %v2683_v63  ;;  %3623 = vmatpush3.xpose.msk.msra.mxu1 %vm452_vm0, %v2849_v12  ;;  %v2998_v63 = vld [vmem:[#allocation5 + $0x30] sm:$0xff] }
 0x3d0   : > { %3605 = vmatprep.subr.msk.mxu0 %vm452_vm0, %v2682_v16  ;;  %3624 = vmatprep.subr.msk.mxu1 %vm452_vm0, %v2848_v55 }
 0x3d3   : > { %3606 = vmatpush3.xpose.msk.msra.mxu0 %vm452_vm0, %v2682_v16  ;;  %3625 = vmatpush3.xpose.msk.msra.mxu1 %vm452_vm0, %v2848_v55  ;;  %v2997_v16 = vld [vmem:[#allocation5 + $0x28] sm:$0xff] }
 0x3d4   : > { %3607 = vmatprep.subr.msk.mxu0 %vm452_vm0, %v2681_v17  ;;  %3626 = vmatprep.subr.msk.mxu1 %vm452_vm0, %v2847_v59 }
 0x3d7   : > { %3608 = vmatpush3.xpose.msk.msra.mxu0 %vm452_vm0, %v2681_v17  ;;  %3627 = vmatpush3.xpose.msk.msra.mxu1 %vm452_vm0, %v2847_v59  ;;  %v2996_v17 = vld [vmem:[#allocation5 + $0x20] sm:$0xff] }
 0x3d8   : > { %3609 = vmatprep.subr.msk.mxu0 %vm452_vm0, %v2680_v24  ;;  %3628 = vmatprep.subr.msk.mxu1 %vm452_vm0, %v2846_v56 }
 0x3db   : > { %3610 = vmatpush3.xpose.msk.msra.mxu0 %vm452_vm0, %v2680_v24  ;;  %3629 = vmatpush3.xpose.msk.msra.mxu1 %vm452_vm0, %v2846_v56 }
 0x3dc   : > { %3630 = vmatprep.subr.msk.mxu1 %vm452_vm0, %v2845_v13  ;;  %3649 = vmatprep.subr.mxu0 %v2999_v7 }
 0x3df   : > { %3631 = vmatpush3.xpose.msk.msra.mxu1 %vm452_vm0, %v2845_v13 }
 0x3e0   : > { %3632 = vmatprep.subr.msk.mxu1 %vm452_vm0, %v2844_v50 }
 0x3e3   : > { %3633 = vmatpush3.xpose.msk.msra.mxu1 %vm452_vm0, %v2844_v50 }
 0x3e4   : > { %3634 = vmatprep.subr.msk.mxu1 %vm452_vm0, %v2843_v11 }
 0x3e7   : > { %3635 = vmatpush3.xpose.msk.msra.mxu1 %vm452_vm0, %v2843_v11 }
 0x3e8   : > { %3636 = vmatprep.subr.msk.mxu1 %vm452_vm0, %v2842_v14 }
 0x3eb   : > { %3637 = vmatpush3.xpose.msk.msra.mxu1 %vm452_vm0, %v2842_v14 }
 0x3ec   : > { %3638 = vmatprep.subr.msk.mxu1 %vm452_vm0, %v2841_v15 }
 0x3ef   : > { %3639 = vmatpush3.xpose.msk.msra.mxu1 %vm452_vm0, %v2841_v15 }
 0x3f0   : > { %3640 = vmatprep.subr.msk.mxu1 %vm452_vm0, %v2840_v49 }
 0x3f3   : > { %3641 = vmatpush3.xpose.msk.msra.mxu1 %vm452_vm0, %v2840_v49  ;;  %v3109_v49 = vsub.s32 4, %v4621_v27 }
 0x3f4   : > { %3642 = vmatprep.subr.msk.mxu1 %vm452_vm0, %v2839_v60 }
 0x3f7   : > { %3643 = vmatpush3.xpose.msk.msra.mxu1 %vm452_vm0, %v2839_v60  ;;  %v3115_v60 = vsub.s32 5, %v4621_v27 }
 0x3f8   : > { %3644 = vmatprep.subr.msk.mxu1 %vm452_vm0, %v2838_v2 }
 0x3fb   : > { %3645 = vmatpush3.xpose.msk.msra.mxu1 %vm452_vm0, %v2838_v2  ;;  %v3110_v2 = vrot.slane %v4627_v54, %v3109_v49 }
 0x45f   : > { %v2091_v9 = vpop.f32.mrf.mxu0 }
 0x460   : > { %2648 = vxpose.xlu1.b32.start [1/8] (short) (narrow) %v2091_v9, 16  ;;  %v2995_v9 = vld [vmem:[#allocation5 + $0x18] sm:$0xff] }
 0x461   : > { %v3545_v21 = vpop.f32.mrf.mxu0 }
 0x462   : > { %v2170_v25 = vpop.f32.mrf.mxu1  ;;  %v2994_v21 = vld [vmem:[#allocation5 + $0x10] sm:$0xff] }
 0x464   : > { %2649 = vxpose.xlu1.b32.cont [2/8] (short) (narrow) %v2170_v25, 16  ;;  %v3552_v19 = vpop.f32.mrf.mxu1 }
 0x46c   : > { %v2328_v23 = vpop.f32.mrf.mxu1 }
 0x46e   : > { %v2249_v28 = vpop.f32.mrf.mxu0  ;;  %v3566_v29 = vpop.f32.mrf.mxu1 }
 0x46f   : > { %2650 = vxpose.xlu1.b32.cont [3/8] (short) (narrow) %v2249_v28, 16 }
 0x470   : > { %v3559_v30 = vpop.f32.mrf.mxu0 }
 0x471   : > { %v2828_v30 = vsub.s32 1, %v4621_v27 }
 0x473   : > { %2651 = vxpose.xlu1.b32.cont [4/8] (short) (narrow) %v2328_v23, 16 }
 0x474   : > { %v2486_v33 = vpop.f32.mrf.mxu1 }
 0x476   : > { %v2407_v37 = vpop.f32.mrf.mxu0  ;;  %v3580_v22 = vpop.f32.mrf.mxu1 }
 0x477   : > { %2652 = vxpose.xlu1.b32.cont [5/8] (short) (narrow) %v2407_v37, 16  ;;  %v2829_v37 = vrot.slane %v4627_v54, %v2828_v30 }
 0x478   : > { %v3573_v38 = vpop.f32.mrf.mxu0 }
 0x47b   : > { %2653 = vxpose.xlu1.b32.cont [6/8] (short) (narrow) %v2486_v33, 16  ;;  %v2834_v33 = vsub.s32 2, %v4621_v27 }
 0x47e   : > { %v2565_v36 = vpop.f32.mrf.mxu0  ;;  %v2644_v39 = vpop.f32.mrf.mxu1 }
 0x47f   : > { %2654 = vxpose.xlu1.b32.cont [7/8] (short) (narrow) %v2565_v36, 16  ;;  %v2835_v36 = vrot.slane %v4627_v54, %v2834_v33 }
 0x480   : > { %v3587_v51 = vpop.f32.mrf.mxu0  ;;  %v3594_v40 = vpop.f32.mrf.mxu1 }
 0x483   : > { %2655 = vxpose.xlu1.b32.end [8/8] (short) (narrow) %v2644_v39, 16 }
 0x4e3   : > { %v2664_v41 = vpop.trf.xlu1 }
 0x4e4   : > { %3611 = vmatprep.mubr.msk.f32.mxu0 %vm452_vm0, %v2664_v41 }
 0x4e7   : > { %v2665_v1 = vpop.trf.xlu1 }
 0x4e8   : > { %3612 = vmatmul.mubr.msk.f32.vlgmr.msra.gmra.mxu0 %vm452_vm0, %v2665_v1 }
 0x4e9   : > { %3650 = vmatpush3.xpose.msra.mxu0 %v2999_v7 }
 0x4ea   : > { %3651 = vmatprep.subr.mxu0 %v2998_v63 }
 0x4ed   : > { %3652 = vmatpush3.xpose.msra.mxu0 %v2998_v63  ;;  %v3116_v63 = vrot.slane %v4627_v54, %v3115_v60 }
 0x4ee   : > { %3653 = vmatprep.subr.mxu0 %v2997_v16 }
 0x4f1   : > { %3654 = vmatpush3.xpose.msra.mxu0 %v2997_v16 }
 0x4f2   : > { %3655 = vmatprep.subr.mxu0 %v2996_v17 }
 0x4f5   : > { %3656 = vmatpush3.xpose.msra.mxu0 %v2996_v17 }
 0x4f6   : > { %3657 = vmatprep.subr.mxu0 %v2995_v9 }
 0x4f9   : > { %3658 = vmatpush3.xpose.msra.mxu0 %v2995_v9 }
 0x4fa   : > { %3659 = vmatprep.subr.mxu0 %v2994_v21 }
 0x4fd   : > { %3660 = vmatpush3.xpose.msra.mxu0 %v2994_v21 }
 0x4fe   : > { %3661 = vmatprep.subr.mxu0 %v2993_v43 }
 0x501   : > { %3662 = vmatpush3.xpose.msra.mxu0 %v2993_v43 }
 0x5a8   : > { %v3613_v32 = vpop.f32.mrf.mxu0 }
 0x5a9   : > { %v2794_v53 = vadd.f32 %v3613_v32, %v2691_v20  ;;  %v3309_v32 = vld [vmem:[%s4797_s9] ss:$0 sm:$0xff] }
 0x5aa   : > { %v2788_v6 = vpop.f32.mrf.mxu0 }
 0x5ab   : > { %v2789_v44 = vadd.f32 %v2788_v6, %v2691_v20  ;;  %v2798_v26 = vadd.f32 %v3813_v45, %v2794_v53  ;;  %v2992_v20 = vld [vmem:[#allocation5] sm:$0xff]  ;;  %v3002_v45 = vsub.s32 3, %v4621_v27 }
 0x5ac   : > { %3663 = vmatprep.subr.mxu0 %v2992_v20 }
 0x5ad   : > { %v2797_v4 = vadd.f32 %v3812_v34, %v2789_v44  ;;  %v2802_v35 = vsel %vm452_vm0, %v2798_v26, 0.0  ;;  %3664 = vmatpush3.xpose.msra.mxu0 %v2992_v20 }
 0x5af   : > { %v2799_v31 = vsel %vm452_vm0, %v2797_v4, 0.0 }
 0x5b0   : > { %2800 = vadd.xlane.f32.xlu0 %v2799_v31 }
 0x5b4   : > { %2803 = vadd.xlane.f32.xlu0 %v2802_v35 }
 0x639   : > { %v2801_v42 = vpop.xlane.xlu0 %2800 }
 0x63a   : > { %v2806_v62 = vmul.f32 0.015625, %v2801_v42 }
 0x63c   : > { %v2808_v0 = vsub.f32 %v2797_v4, %v2806_v62 }
 0x63d   : > { %v2804_v47 = vpop.xlane.xlu0 %2803 }
 0x63e   : > { %v2807_v3 = vmul.f32 0.015625, %v2804_v47  ;;  %v2810_v18 = vmul.f32 %v2808_v0, %v2808_v0 }
 0x640   : > { %v2809_v57 = vsub.f32 %v2798_v26, %v2807_v3  ;;  %v2812_v61 = vsel %vm452_vm0, %v2810_v18, 0.0  ;;  %v3003_v26 = vrot.slane %v4627_v54, %v3002_v45 }
 0x641   : > { %2813 = vadd.xlane.f32.xlu0 %v2812_v61 }
 0x642   : > { %v2811_v58 = vmul.f32 %v2809_v57, %v2809_v57 }
 0x644   : > { %v2815_v10 = vsel %vm452_vm0, %v2811_v58, 0.0 }
 0x645   : > { %2816 = vadd.xlane.f32.xlu0 %v2815_v10 }
 0x6ca   : > { %v2814_v25 = vpop.xlane.xlu0 %2813 }
 0x6cb   : > { %v2818_v24 = vmul.f32 0.015625, %v2814_v25 }
 0x6cd   : > { %v2820_v19 = vadd.f32 1e-05, %v2818_v24 }
 0x6ce   : > { %v2817_v23 = vpop.xlane.xlu0 %2816 }
 0x6cf   : > { %3804 = vrsqrt.f32 %v2820_v19  ;;  %v2819_v28 = vmul.f32 0.015625, %v2817_v23 }
 0x6d1   : > { %v2821_v29 = vadd.f32 1e-05, %v2819_v28 }
 0x6d3   : > { %3806 = vrsqrt.f32 %v2821_v29 }
 0x6dc   : > { %v3805_v22 = vpop.eup %3804 }
 0x6dd   : > { %v2824_v38 = vmul.f32 %v3805_v22, %v2808_v0 }
 0x6df   : > { %v2830_v39 = vmul.f32 %v2829_v37, %v2824_v38 }
 0x6e0   : > { %v3807_v51 = vpop.eup %3806 }
 0x6e1   : > { %v2825_v40 = vmul.f32 %v3807_v51, %v2809_v57  ;;  %v2836_v41 = vadd.f32 %v2835_v36, %v2830_v39 }
 0x6e3   : > { %v2831_v1 = vmul.f32 %v2829_v37, %v2825_v40  ;;  %3646 = vmatprep.mubr.msk.f32.mxu1 %vm452_vm0, %v2836_v41 }
 0x6e5   : > { %v2837_v5 = vadd.f32 %v2835_v36, %v2831_v1 }
 0x6e7   : > { %3647 = vmatmul.mubr.msk.f32.vlgmr.msra.gmra.mxu1 %vm452_vm0, %v2837_v5 }
 0x7a7   : > { %v3648_v6 = vpop.f32.mrf.mxu1 }
 0x7a8   : > { %v2987_v53 = vadd.f32 %v3648_v6, %v3309_v32 }
 0x7a9   : > { %v2981_v44 = vpop.f32.mrf.mxu1 }
 0x7aa   : > { %v2982_v34 = vadd.f32 %v3309_v32, %v2981_v44  ;;  %v2991_v31 = vmax.f32 %v2987_v53, 0.0 }
 0x7ac   : > { %v2990_v4 = vmax.f32 %v2982_v34, 0.0 }
 0x7ae   : > { %3665 = vmatprep.mubr.f32.mxu0 %v2990_v4 }
 0x7af   : > { %3666 = vmatmul.mubr.f32.vlgmr.msra.gmra.mxu0 %v2991_v31 }
 0x86f   : > { %v3667_v35 = vpop.f32.mrf.mxu0 }
 0x870   : > { %v3076_v48 = vadd.f32 %v3667_v35, %v3003_v26 }
 0x871   : > { %v3070_v46 = vpop.f32.mrf.mxu0 }
 0x872   : > { %v3071_v52 = vadd.f32 %v3070_v46, %v3003_v26  ;;  %v3080_v55 = vadd.f32 %v3076_v48, %v2837_v5 }
 0x874   : > { %v3079_v8 = vadd.f32 %v3071_v52, %v2836_v41  ;;  %v3084_v59 = vsel %vm452_vm0, %v3080_v55, 0.0 }
 0x876   : > { %v3081_v12 = vsel %vm452_vm0, %v3079_v8, 0.0 }
 0x877   : > { %3082 = vadd.xlane.f32.xlu0 %v3081_v12 }
 0x87b   : > { %3085 = vadd.xlane.f32.xlu0 %v3084_v59 }
 0x900   : > { %v3083_v56 = vpop.xlane.xlu0 %3082 }
 0x901   : > { %v3087_v13 = vmul.f32 0.015625, %v3083_v56 }
 0x903   : > { %v3089_v42 = vsub.f32 %v3079_v8, %v3087_v13 }
 0x904   : > { %v3086_v62 = vpop.xlane.xlu0 %3085 }
 0x905   : > { %v3088_v0 = vmul.f32 0.015625, %v3086_v62  ;;  %v3091_v47 = vmul.f32 %v3089_v42, %v3089_v42 }
 0x907   : > { %v3090_v3 = vsub.f32 %v3080_v55, %v3088_v0  ;;  %v3093_v18 = vsel %vm452_vm0, %v3091_v47, 0.0 }
 0x908   : > { %3094 = vadd.xlane.f32.xlu0 %v3093_v18 }
 0x909   : > { %v3092_v57 = vmul.f32 %v3090_v3, %v3090_v3 }
 0x90b   : > { %v3096_v61 = vsel %vm452_vm0, %v3092_v57, 0.0 }
 0x90c   : > { %3097 = vadd.xlane.f32.xlu0 %v3096_v61 }
 0x991   : > { %v3095_v58 = vpop.xlane.xlu0 %3094 }
 0x992   : > { %v3099_v10 = vmul.f32 0.015625, %v3095_v58 }
 0x994   : > { %v3101_v50 = vadd.f32 1e-05, %v3099_v10 }
 0x995   : > { %v3098_v11 = vpop.xlane.xlu0 %3097 }
 0x996   : > { %3808 = vrsqrt.f32 %v3101_v50  ;;  %v3100_v14 = vmul.f32 0.015625, %v3098_v11 }
 0x998   : > { %v3102_v15 = vadd.f32 1e-05, %v3100_v14 }
 0x99a   : > { %3810 = vrsqrt.f32 %v3102_v15 }
 0x9a3   : > { %v3809_v7 = vpop.eup %3808 }
 0x9a4   : > { %v3105_v16 = vmul.f32 %v3809_v7, %v3089_v42 }
 0x9a6   : > { %v3111_v17 = vmul.f32 %v3110_v2, %v3105_v16 }
 0x9a7   : > { %v3811_v9 = vpop.eup %3810 }
 0x9a8   : > { %v3117_v21 = vadd.f32 %v3116_v63, %v3111_v17  ;;  %v3106_v25 = vmul.f32 %v3811_v9, %v3090_v3 }
 0x9aa   : > { %v3112_v24 = vmul.f32 %v3110_v2, %v3106_v25  ;;  %3119 = vst.msk [vmem:[%s392_s23] sm:$0xff] %vm452_vm0, %v3117_v21 }
 0x9ac   : > { %v3118_v27 = vadd.f32 %v3116_v63, %v3112_v24 }
 0x9ae   : > { %3120 = vst.msk [vmem:[%s392_s23 + $0x8] sm:$0xff] %vm452_vm0, %v3118_v27 }
 0x9af   : > { %3881 = shalt.err (!%p3878_p0)
}
 0x9b0   : > { %s3882_s27 = scalar_lea.hbm %s4742_s20, 256  ;;  %s3886_s12 = scalar_lea.hbm %s4798_s10, 512 }
 0x9b1   : > { %p3883_p5 = scmp.ne.s32.totalorder %s4742_s20, %s3882_s27  ;;  %p3887_p4 = scmp.lt.s32.totalorder %s4742_s20, %s4798_s10 }
 0x9b2   : > { %p3888_p6 = scmp.lt.s32.totalorder %s3886_s12, %s3882_s27 }
 0x9b3   : > { %p3884_p2 = pnand %p3883_p5, %p4827_p11 }
 0x9b4   : > { %p3889_p8 = por %p3888_p6, %p3887_p4 }
 0x9b5   : > { %p3885_p1 = pneg %p3884_p2 }
 0x9b7   : > { %p3890_p3 = pnand %p3889_p8, %p3885_p1 }
 0x9b9   : > { %3893 = shalt.err (!%p3890_p3)
}
 0x9ba   : > { %s3948_s13 = smov 128   ;;  %s3949_s29 = smov 8  }
 0x9bb   : > { %3674 = dma.vmem_to_hbm [thread:$0]  (%p4827_p11), %s4744_s24, 256, %s4742_s20, %s3122_s17, %s3948_s13, %s3948_s13, %s3949_s29  }
 0x9bc PF: > { %s4828_s25 = sld [smem:[#allocation11_spill]]  ;;  %p4831_p9 = scmp.ge.s32.totalorder %s3936_s16, 2 }
 0x9bd   : > { %s4829_s6 = sld [smem:[#allocation12_spill]] }
 0x9c2   : > { %s3150_s21 = sand.u32 1, %s4828_s25  }
 0x9c3   : > { %p4830_p7 = scmp.ne.s32.totalorder %s4829_s6, 0  ;;  %s3151_s11 = scalar_lea.sflag [#allocation4], %s3150_s21 }
 0x9c5   : > { %p3685_p10 = pnand %p4831_p9, %p4830_p7 }
 0x9c7   : > { %p3686_p12 = pneg %p3685_p10 }
 0x9c9   : > { %3919 = dma.done.wait (%p3686_p12), %s3151_s11, 256  }
 0x9ca   : > { %3921 = vsyncadd (%p3686_p12), %s3151_s11, 4294967040  ;;  %s4832_s16 = sld [smem:[#allocation13_spill]]  ;;  %s4833_s13 = smov %s3928_s14 }
 0x9cb   : > { %s4834_s14 = smov %s3932_s15  ;;  %s4835_s15 = smov %s4079_s18 }
 0x9d0   : > { %p24_p13 = scmp.ge.s32.totalorder %s4832_s16, 4  }
 0x9d2   :  { %26 = sbr.rel (!%p24_p13) target bundleno = 8 (0x8), region = 109 }
 0x9d7   :  { %3156 = vsyncpa [#allocation3], 1 }
 0x9d8   :  { %3158 = vsyncpa [#allocation3 + $0x1], 1 }
 0x9d9   :  { %3159 = vsyncpa [#allocation6], 1 }
 0x9da   :  { %3160 = vsyncpa [#allocation4], 1 }
 0x9db   :  { %3162 = vsyncpa [#allocation4 + $0x1], 1 }

</bundles_post_ra>
